<compile_context>
chip_gen: v7x
topology: tpu7x:2x2x1
jax: 0.10.0
libtpu: 0.0.40
codegen_flags: <defaults>
</compile_context>

<pallas_src>
import functools
import math

import jax
import jax.numpy as jnp
from jax.experimental import pallas as pl
from jax.experimental.pallas import tpu as pltpu


# ----------------------------------------------------------------------------
# elementwise helpers
# ----------------------------------------------------------------------------
def _erf(x):
    # Abramowitz & Stegun 7.1.26 (|err| < 1.5e-7) — exact GELU to ~f32.
    a1, a2, a3, a4, a5 = (0.254829592, -0.284496736, 1.421413741,
                          -1.453152027, 1.061405429)
    p = 0.3275911
    s = jnp.sign(x)
    z = jnp.abs(x)
    t = 1.0 / (1.0 + p * z)
    poly = ((((a5 * t + a4) * t + a3) * t + a2) * t + a1) * t
    return s * (1.0 - poly * jnp.exp(-z * z))


def _gelu_exact(x):
    return 0.5 * x * (1.0 + _erf(x * (1.0 / math.sqrt(2.0))))


def _gelu_tanh(x):
    # tanh approximation: 1 EUP tanh + a few VPU ops (bf16 path only).
    c = math.sqrt(2.0 / math.pi)
    return 0.5 * x * (1.0 + jnp.tanh(c * (x + 0.044715 * x * x * x)))


def _layer_norm(v, w, b, eps=1e-6):
    mu = jnp.mean(v, axis=-1, keepdims=True)
    var = jnp.mean((v - mu) ** 2, axis=-1, keepdims=True)
    return (v - mu) * jax.lax.rsqrt(var + eps) * w + b


# ----------------------------------------------------------------------------
# kernel 1: LayerNorm(ln_1) + Q/K/V projections (three dense (tr, D) stores)
# ----------------------------------------------------------------------------
def _ln_qkv_kernel(x_ref, g_ref, b_ref, wq_ref, wk_ref, wv_ref,
                   bq_ref, bk_ref, bv_ref, q_ref, k_ref, v_ref):
    x = x_ref[...].astype(jnp.float32)
    h = _layer_norm(x, g_ref[...], b_ref[...]).astype(wq_ref.dtype)
    q_ref[...] = (jnp.dot(h, wq_ref[...], preferred_element_type=jnp.float32)
                  + bq_ref[...]).astype(q_ref.dtype)
    k_ref[...] = (jnp.dot(h, wk_ref[...], preferred_element_type=jnp.float32)
                  + bk_ref[...]).astype(k_ref.dtype)
    v_ref[...] = (jnp.dot(h, wv_ref[...], preferred_element_type=jnp.float32)
                  + bv_ref[...]).astype(v_ref.dtype)


# ----------------------------------------------------------------------------
# kernel 2: attention — full K/V residency, all heads of a group per step,
#            padded keys masked, single lane-dense (tq, Dg) store.
#   Q is pre-scaled by 1/sqrt(head_dim) (folded into Wq/bq host-side).
# ----------------------------------------------------------------------------
def _attn_kernel(q_ref, k_ref, v_ref, o_ref, *, heads, head_dim, kv_len,
                 approx_recip):
    tq = q_ref.shape[1]
    sp = k_ref.shape[1]
    qa = q_ref[0]                       # (tq, heads*head_dim)
    ka = k_ref[0]                       # (sp, heads*head_dim)
    va = v_ref[0]

    need_mask = kv_len < sp
    if need_mask:
        kv_valid = jax.lax.broadcasted_iota(jnp.int32, (tq, sp), 1) < kv_len

    outs = []
    for j in range(heads):              # static unroll over heads in the block
        lo = j * head_dim
        qh = qa[:, lo:lo + head_dim]
        kh = ka[:, lo:lo + head_dim]
        vh = va[:, lo:lo + head_dim]
        s = jax.lax.dot_general(qh, kh, (((1,), (1,)), ((), ())),
                                preferred_element_type=jnp.float32)   # (tq, sp)
        if need_mask:
            s = jnp.where(kv_valid, s, -1e30)
        m = jnp.max(s, axis=-1, keepdims=True)
        p = jnp.exp(s - m)
        l = jnp.sum(p, axis=-1, keepdims=True)
        oh = jnp.dot(p.astype(vh.dtype), vh, preferred_element_type=jnp.float32)
        outs.append(oh * pl.reciprocal(l, approx=approx_recip))

    o = outs[0] if len(outs) == 1 else jnp.concatenate(outs, axis=-1)
    o_ref[0] = o.astype(o_ref.dtype)


# ----------------------------------------------------------------------------
# kernel 3: out-proj + residual + LayerNorm(ln_2) + MLP + residual
#           (MLP hidden dim optionally K-tiled over a reduction grid axis)
# ----------------------------------------------------------------------------
def _proj_mlp_kernel(x_ref, a_ref, wo_ref, bo_ref, g2_ref, be2_ref,
                     w1_ref, b1_ref, w2_ref, b2_ref, o_ref,
                     x1_sc, h2_sc, acc_sc, *, use_tanh_gelu):
    m_idx = pl.program_id(1)

    @pl.when(m_idx == 0)
    def _():
        x = x_ref[...].astype(jnp.float32)
        attn = jnp.dot(a_ref[...], wo_ref[...],
                       preferred_element_type=jnp.float32) + bo_ref[...]
        x1 = x + attn                                              # residual 1
        x1_sc[...] = x1
        h2_sc[...] = _layer_norm(x1, g2_ref[...], be2_ref[...]).astype(h2_sc.dtype)
        acc_sc[...] = jnp.zeros_like(acc_sc)

    h2 = h2_sc[...]
    mm = jnp.dot(h2, w1_ref[...], preferred_element_type=jnp.float32) + b1_ref[...]
    mm = (_gelu_tanh(mm) if use_tanh_gelu else _gelu_exact(mm)).astype(w2_ref.dtype)
    acc_sc[...] += jnp.dot(mm, w2_ref[...], preferred_element_type=jnp.float32)

    @pl.when(m_idx == pl.num_programs(1) - 1)
    def _():
        o_ref[...] = (x1_sc[...] + acc_sc[...] + b2_ref[...]).astype(o_ref.dtype)


# ----------------------------------------------------------------------------
# tiling / budget helpers
# ----------------------------------------------------------------------------
def _round_up(x, m):
    return (x + m - 1) // m * m


def _row_tile(rows, target):
    t = min(target, rows)
    t -= t % 8
    t = max(t, 8)
    while rows % t:
        t -= 8
    return t


def _seq_tiling(seq, target):
    nq = max(1, -(-seq // target))
    tq = _round_up(-(-seq // nq), 8)
    return tq, nq, tq * nq


def _vmem_budget():
    phys = 128 * 1024 * 1024
    try:
        info = pltpu.get_tpu_info()
        phys = int(getattr(info, "vmem_capacity_bytes", phys)) or phys
    except Exception:
        pass
    return (phys * 3) // 4          # ~96 MiB on v5e/v6e, ~48 MiB on v7x


def _choose_m_tile(D, M, itemsize, budget):
    if M % 128:
        return M                                    # cannot tile legally
    if 2 * D * M * itemsize <= budget // 3:
        return M                                    # keep W1+W2 resident
    tm = M
    while (tm % 2 == 0 and (tm // 2) % 128 == 0
           and 4 * D * tm * itemsize > budget // 4):
        tm //= 2
    return tm


def _wspec(shape, index_map, single_buffer):
    # Constant-index (resident) weight blocks: request single buffering so the
    # auto-pipeliner does not double-buffer them (halves weight VMEM on v7x).
    if single_buffer:
        return pl.BlockSpec(shape, index_map, pipeline_mode=pl.Buffered(1))
    return pl.BlockSpec(shape, index_map)


# ----------------------------------------------------------------------------
# wrapper
# ----------------------------------------------------------------------------
def _encoder_block_impl(x, params, num_heads, *, compute_dtype, q_tile_target,
                        row_tile_target, head_groups, m_tile,
                        single_buffer_weights):
    B, S, D = x.shape
    H = num_heads
    assert D % H == 0, "hidden_dim must be divisible by num_heads"
    hd = D // H
    M = params["fc1_w"].shape[0]
    f32 = jnp.float32
    cdt = compute_dtype
    itemsize = jnp.dtype(cdt).itemsize

    vmem_limit = _vmem_budget()

    # sequence tiling: pad S up to a multiple-of-8 query tile (masked in attn)
    tq, nq, Sp = _seq_tiling(S, q_tile_target)

    # head groups: keep both v7x TensorCores busy when B*nq is tiny, but only
    # when the per-group lane width stays a multiple of 128.
    if head_groups is None:
        head_groups = 1
        if B * nq < 2:
            for g in (2, 4):
                if H % g == 0 and (D // g) % 128 == 0:
                    head_groups = g
                    break
    n_hg = head_groups
    assert H % n_hg == 0
    Dg = D // n_hg
    assert n_hg == 1 or Dg % 128 == 0, "head_groups must give 128-aligned blocks"
    Hg = H // n_hg

    # MLP hidden-dim tiling (v7x VMEM): stream W1/W2 when too big to reside
    if m_tile is None:
        m_tile = _choose_m_tile(D, M, itemsize, vmem_limit)
    assert M % m_tile == 0 and (m_tile == M or m_tile % 128 == 0)
    nm = M // m_tile

    # ---- host-side weight prep (layout plumbing, free) ----------------------
    w_in = jnp.asarray(params["in_proj_w"], f32)          # (3D, D) torch layout
    b_in = jnp.asarray(params["in_proj_b"], f32)
    scale = 1.0 / math.sqrt(float(hd))                    # fold softmax scale
    wq = (w_in[:D] * scale).T.astype(cdt)                 # (D, D), y = x @ W
    wk = w_in[D:2 * D].T.astype(cdt)
    wv = w_in[2 * D:].T.astype(cdt)
    bq = (b_in[:D] * scale).reshape(1, D)
    bk = b_in[D:2 * D].reshape(1, D)
    bv = b_in[2 * D:].reshape(1, D)

    row = lambda a: jnp.asarray(a, f32).reshape(1, -1)
    ln1w, ln1b = row(params["ln1_w"]), row(params["ln1_b"])
    ln2w, ln2b = row(params["ln2_w"]), row(params["ln2_b"])
    wo = jnp.asarray(params["out_proj_w"], f32).T.astype(cdt)     # (D, D)
    bo = row(params["out_proj_b"])
    w1 = jnp.asarray(params["fc1_w"], f32).T.astype(cdt)          # (D, M)
    b1 = row(params["fc1_b"])
    w2 = jnp.asarray(params["fc2_w"], f32).T.astype(cdt)          # (M, D)
    b2 = row(params["fc2_b"])

    # ---- pad sequence, flatten to a (B*Sp, D) row grid -----------------------
    xp = x if Sp == S else jnp.pad(x, ((0, 0), (0, Sp - S), (0, 0)))
    xf = xp.reshape(B * Sp, D)
    R = B * Sp
    tr = _row_tile(R, row_tile_target)
    nr = R // tr
    sb = bool(single_buffer_weights)

    cparams_rows = pltpu.CompilerParams(
        dimension_semantics=("parallel",), vmem_limit_bytes=vmem_limit)

    # ---- kernel 1: LN1 + Q/K/V projections -----------------------------------
    act1 = lambda: pl.BlockSpec((tr, D), lambda i: (i, 0))
    c1 = lambda shape: _wspec(shape, lambda i: (0, 0), sb)
    q, k, v = pl.pallas_call(
        _ln_qkv_kernel,
        out_shape=[jax.ShapeDtypeStruct((R, D), cdt)] * 3,
        grid=(nr,),
        in_specs=[act1(),
                  c1((1, D)), c1((1, D)),                     # ln1 gamma/beta
                  c1((D, D)), c1((D, D)), c1((D, D)),         # Wq, Wk, Wv
                  c1((1, D)), c1((1, D)), c1((1, D))],        # bq, bk, bv
        out_specs=[act1(), act1(), act1()],
        compiler_params=cparams_rows,
    )(xf, ln1w, ln1b, wq, wk, wv, bq, bk, bv)

    # free metadata reshapes (leading-dim split only, no relayout)
    q3 = q.reshape(B, Sp, D)
    k3 = k.reshape(B, Sp, D)
    v3 = v.reshape(B, Sp, D)

    # ---- kernel 2: attention (full K/V per step, no XLA transposes) ----------
    # TODO(synk): add a K-tiled online-softmax fallback for sequences so long
    # that (Sp, Dg) K/V blocks no longer fit VMEM (never the case for ViT).
    attn = pl.pallas_call(
        functools.partial(_attn_kernel, heads=Hg, head_dim=hd, kv_len=S,
                          approx_recip=(cdt != jnp.float32)),
        out_shape=jax.ShapeDtypeStruct((B, Sp, D), cdt),
        grid=(B, n_hg, nq),
        in_specs=[
            pl.BlockSpec((1, tq, Dg), lambda b, g, i: (b, i, g)),
            pl.BlockSpec((1, Sp, Dg), lambda b, g, i: (b, 0, g)),
            pl.BlockSpec((1, Sp, Dg), lambda b, g, i: (b, 0, g)),
        ],
        out_specs=pl.BlockSpec((1, tq, Dg), lambda b, g, i: (b, i, g)),
        compiler_params=pltpu.CompilerParams(
            dimension_semantics=("parallel", "parallel", "parallel"),
            vmem_limit_bytes=vmem_limit),
    )(q3, k3, v3)

    af = attn.reshape(R, D)

    # ---- kernel 3: out-proj + residual + LN2 + MLP + residual -----------------
    act3 = lambda: pl.BlockSpec((tr, D), lambda i, m: (i, 0))
    c3 = lambda shape: _wspec(shape, lambda i, m: (0, 0), sb)
    if nm == 1:
        w1_spec, b1_spec, w2_spec = c3((D, M)), c3((1, M)), c3((M, D))
    else:
        w1_spec = pl.BlockSpec((D, m_tile), lambda i, m: (0, m))
        b1_spec = pl.BlockSpec((1, m_tile), lambda i, m: (0, m))
        w2_spec = pl.BlockSpec((m_tile, D), lambda i, m: (m, 0))

    out = pl.pallas_call(
        functools.partial(_proj_mlp_kernel, use_tanh_gelu=(cdt != jnp.float32)),
        out_shape=jax.ShapeDtypeStruct((R, D), x.dtype),
        grid=(nr, nm),
        in_specs=[act3(), act3(),                            # x rows, attn rows
                  c3((D, D)), c3((1, D)),                    # W_o, b_o
                  c3((1, D)), c3((1, D)),                    # ln2 gamma/beta
                  w1_spec, b1_spec, w2_spec,
                  c3((1, D))],                               # b2
        out_specs=pl.BlockSpec((tr, D), lambda i, m: (i, 0)),
        scratch_shapes=[
            pltpu.VMEM((tr, D), jnp.float32),   # x1 (residual 1)
            pltpu.VMEM((tr, D), cdt),           # LayerNorm(ln_2) activations
            pltpu.VMEM((tr, D), jnp.float32),   # MLP accumulator
        ],
        compiler_params=pltpu.CompilerParams(
            dimension_semantics=("parallel", "arbitrary"),
            vmem_limit_bytes=vmem_limit),
    )(xf, af, wo, bo, ln2w, ln2b, w1, b1, w2, b2)

    out = out.reshape(B, Sp, D)
    if Sp != S:
        out = out[:, :S, :]
    return out


def encoder_block(x, params, num_heads, *, compute_dtype=jnp.bfloat16,
                  q_tile_target=256, row_tile_target=256, head_groups=None,
                  m_tile=None):
    kwargs = dict(compute_dtype=compute_dtype, q_tile_target=q_tile_target,
                  row_tile_target=row_tile_target, head_groups=head_groups,
                  m_tile=m_tile)
    try:
        return _encoder_block_impl(x, params, num_heads,
                                   single_buffer_weights=True, **kwargs)
    except Exception:
        # pl.Buffered(1) (single-buffered resident weights) unsupported on this
        # JAX build — fall back to default double-buffered weight blocks.
        return _encoder_block_impl(x, params, num_heads,
                                   single_buffer_weights=False, **kwargs)


# ----------------------------------------------------------------------------
# pure-JAX reference (mirrors PyTorch EncoderBlock forward, eval mode)
# ----------------------------------------------------------------------------
def encoder_block_reference(x, params, num_heads):
    D = x.shape[-1]
    hd = D // num_heads
    scale = 1.0 / math.sqrt(float(hd))

    wq, wk, wv = jnp.split(params["in_proj_w"], 3, axis=0)
    bq, bk, bv = jnp.split(params["in_proj_b"], 3, axis=0)

    h = _layer_norm(x, params["ln1_w"], params["ln1_b"])
    q = h @ wq.T + bq
    k = h @ wk.T + bk
    v = h @ wv.T + bv

    B, S, _ = x.shape
    qh = q.reshape(B, S, num_heads, hd).transpose(0, 2, 1, 3)
    kh = k.reshape(B, S, num_heads, hd).transpose(0, 2, 1, 3)
    vh = v.reshape(B, S, num_heads, hd).transpose(0, 2, 1, 3)
    s = jnp.einsum("bhqd,bhkd->bhqk", qh, kh) * scale
    p = jax.nn.softmax(s, axis=-1)
    o = jnp.einsum("bhqk,bhkd->bhqd", p, vh)
    o = o.transpose(0, 2, 1, 3).reshape(B, S, D)
    attn = o @ params["out_proj_w"].T + params["out_proj_b"]

    x1 = x + attn
    h2 = _layer_norm(x1, params["ln2_w"], params["ln2_b"])
    m = _gelu_exact(h2 @ params["fc1_w"].T + params["fc1_b"])
    m = m @ params["fc2_w"].T + params["fc2_b"]
    return x1 + m


# ----------------------------------------------------------------------------
# deterministic parameter init (shapes follow EncoderBlock.__init__)
# ----------------------------------------------------------------------------
def init_params(key, hidden_dim, mlp_dim):
    D, M = hidden_dim, mlp_dim
    ks = jax.random.split(key, 10)
    nrm = lambda k, shp, sc: jax.random.normal(k, shp, jnp.float32) * sc
    return dict(
        ln1_w=1.0 + 0.1 * nrm(ks[0], (D,), 1.0),
        ln1_b=0.05 * nrm(ks[1], (D,), 1.0),
        in_proj_w=nrm(ks[2], (3 * D, D), D ** -0.5),
        in_proj_b=0.02 * nrm(ks[3], (3 * D,), 1.0),
        out_proj_w=nrm(ks[4], (D, D), D ** -0.5),
        out_proj_b=0.02 * nrm(ks[5], (D,), 1.0),
        ln2_w=1.0 + 0.1 * nrm(ks[6], (D,), 1.0),
        ln2_b=0.05 * nrm(ks[7], (D,), 1.0),
        fc1_w=nrm(ks[8], (M, D), D ** -0.5),
        fc1_b=jnp.zeros((M,), jnp.float32),
        fc2_w=nrm(ks[9], (D, M), M ** -0.5),
        fc2_b=jnp.zeros((D,), jnp.float32),
    )


if __name__ == "__main__":
    def run_case(name, B, S, D, H, MLP, compute_dtype, tol, **kw):
        key = jax.random.PRNGKey(0)
        kx, kp = jax.random.split(key)
        x = jax.random.normal(kx, (B, S, D), jnp.float32)
        params = init_params(kp, D, MLP)
        ref = encoder_block_reference(x, params, num_heads=H)
        out = jax.block_until_ready(
            encoder_block(x, params, num_heads=H,
                          compute_dtype=compute_dtype, **kw))
        assert out.shape == (B, S, D), f"{name}: bad shape {out.shape}"
        err = float(jnp.max(jnp.abs(out.astype(jnp.float32) - ref)))
        assert err < tol, f"{name}: max abs err {err} (tol {tol})"

    # 1) tiny config, f32 compute (exact GELU / exact reciprocal) — tight check
    run_case("f32", B=2, S=8, D=32, H=4, MLP=64,
             compute_dtype=jnp.float32, tol=5e-2)
    # 2) tiny config, bf16 MXU-native path (tanh GELU, approx reciprocal)
    run_case("bf16", B=2, S=8, D=32, H=4, MLP=64,
             compute_dtype=jnp.bfloat16, tol=1.5e-1)
    # 3) exercises: sequence padding + key masking (S=12 -> tile 16), B=1 with
    #    a 2-way head-group grid (128-lane blocks), and the M-tiled MLP
    #    reduction path (mlp_dim=256, m_tile=128).
    run_case("padded", B=1, S=12, D=256, H=4, MLP=256,
             compute_dtype=jnp.bfloat16, tol=2e-1, head_groups=2, m_tile=128)

    print("KERNEL_OK")
</pallas_src>

<mosaic_0001>
module attributes {stable_mosaic.version = 11 : i64} {
  func.func @_ln_qkv_kernel(%arg0: i32, %arg1: memref<16x32xf32, #tpu.memory_space<vmem>>, %arg2: memref<1x32xf32, #tpu.memory_space<vmem>>, %arg3: memref<1x32xf32, #tpu.memory_space<vmem>>, %arg4: memref<32x32xf32, #tpu.memory_space<vmem>>, %arg5: memref<32x32xf32, #tpu.memory_space<vmem>>, %arg6: memref<32x32xf32, #tpu.memory_space<vmem>>, %arg7: memref<1x32xf32, #tpu.memory_space<vmem>>, %arg8: memref<1x32xf32, #tpu.memory_space<vmem>>, %arg9: memref<1x32xf32, #tpu.memory_space<vmem>>, %arg10: memref<16x32xf32, #tpu.memory_space<vmem>>, %arg11: memref<16x32xf32, #tpu.memory_space<vmem>>, %arg12: memref<16x32xf32, #tpu.memory_space<vmem>>) attributes {dimension_semantics = [#tpu.dimension_semantics<parallel>], iteration_bounds = array<i64: 1>, scalar_prefetch = 0 : i64, scratch_operands = 0 : i64, tpu.core_type = #tpu.core_type<tc>, window_params = [{transform_indices = @transform_0, window_bounds = array<i64: 16, 32>}, {pipeline_mode = #tpu.pipeline_mode<synchronous>, transform_indices = @transform_1, window_bounds = array<i64: 1, 32>}, {pipeline_mode = #tpu.pipeline_mode<synchronous>, transform_indices = @transform_2, window_bounds = array<i64: 1, 32>}, {pipeline_mode = #tpu.pipeline_mode<synchronous>, transform_indices = @transform_3, window_bounds = array<i64: 32, 32>}, {pipeline_mode = #tpu.pipeline_mode<synchronous>, transform_indices = @transform_4, window_bounds = array<i64: 32, 32>}, {pipeline_mode = #tpu.pipeline_mode<synchronous>, transform_indices = @transform_5, window_bounds = array<i64: 32, 32>}, {pipeline_mode = #tpu.pipeline_mode<synchronous>, transform_indices = @transform_6, window_bounds = array<i64: 1, 32>}, {pipeline_mode = #tpu.pipeline_mode<synchronous>, transform_indices = @transform_7, window_bounds = array<i64: 1, 32>}, {pipeline_mode = #tpu.pipeline_mode<synchronous>, transform_indices = @transform_8, window_bounds = array<i64: 1, 32>}, {transform_indices = @transform_9, window_bounds = array<i64: 16, 32>}, {transform_indices = @transform_10, window_bounds = array<i64: 16, 32>}, {transform_indices = @transform_11, window_bounds = array<i64: 16, 32>}]} {
    %c0 = arith.constant 0 : index
    %c0_0 = arith.constant 0 : index
    %0 = vector.load %arg1[%c0, %c0_0] : memref<16x32xf32, #tpu.memory_space<vmem>>, vector<16x32xf32>
    %c0_1 = arith.constant 0 : index
    %c0_2 = arith.constant 0 : index
    %1 = vector.load %arg2[%c0_1, %c0_2] : memref<1x32xf32, #tpu.memory_space<vmem>>, vector<1x32xf32>
    %c0_3 = arith.constant 0 : index
    %c0_4 = arith.constant 0 : index
    %2 = vector.load %arg3[%c0_3, %c0_4] : memref<1x32xf32, #tpu.memory_space<vmem>>, vector<1x32xf32>
    %cst = arith.constant dense<0.000000e+00> : vector<16xf32>
    %3 = vector.multi_reduction <add>, %0, %cst [1] : vector<16x32xf32> to vector<16xf32>
    %4 = vector.shape_cast %3 : vector<16xf32> to vector<16x1xf32>
    %cst_5 = arith.constant 3.200000e+01 : f32
    %5 = vector.broadcast %cst_5 : f32 to vector<16x1xf32>
    %6 = arith.divf %4, %5 : vector<16x1xf32>
    %7 = vector.broadcast %6 : vector<16x1xf32> to vector<16x32xf32>
    %8 = arith.subf %0, %7 : vector<16x32xf32>
    %9 = arith.mulf %8, %8 : vector<16x32xf32>
    %cst_6 = arith.constant dense<0.000000e+00> : vector<16xf32>
    %10 = vector.multi_reduction <add>, %9, %cst_6 [1] : vector<16x32xf32> to vector<16xf32>
    %11 = vector.shape_cast %10 : vector<16xf32> to vector<16x1xf32>
    %cst_7 = arith.constant 3.200000e+01 : f32
    %12 = vector.broadcast %cst_7 : f32 to vector<16x1xf32>
    %13 = arith.divf %11, %12 : vector<16x1xf32>
    %14 = vector.broadcast %6 : vector<16x1xf32> to vector<16x32xf32>
    %15 = arith.subf %0, %14 : vector<16x32xf32>
    %cst_8 = arith.constant 9.99999997E-7 : f32
    %16 = vector.broadcast %cst_8 : f32 to vector<16x1xf32>
    %17 = arith.addf %13, %16 : vector<16x1xf32>
    %18 = math.rsqrt %17 : vector<16x1xf32>
    %19 = vector.broadcast %18 : vector<16x1xf32> to vector<16x32xf32>
    %20 = arith.mulf %15, %19 : vector<16x32xf32>
    %21 = vector.broadcast %1 : vector<1x32xf32> to vector<16x32xf32>
    %22 = arith.mulf %20, %21 : vector<16x32xf32>
    %23 = vector.broadcast %2 : vector<1x32xf32> to vector<16x32xf32>
    %24 = arith.addf %22, %23 : vector<16x32xf32>
    %c0_9 = arith.constant 0 : index
    %c0_10 = arith.constant 0 : index
    %25 = vector.load %arg4[%c0_9, %c0_10] : memref<32x32xf32, #tpu.memory_space<vmem>>, vector<32x32xf32>
    %cst_11 = arith.constant dense<0.000000e+00> : vector<16x32xf32>
    %26 = tpu.matmul %24, %25, %cst_11 {dimension_numbers = #tpu.dot_dimension_numbers<[1], [0], [0], [1], [0, 0, 1, 1], [], []>} : vector<16x32xf32>, vector<32x32xf32>, vector<16x32xf32> -> vector<16x32xf32>
    %c0_12 = arith.constant 0 : index
    %c0_13 = arith.constant 0 : index
    %27 = vector.load %arg7[%c0_12, %c0_13] : memref<1x32xf32, #tpu.memory_space<vmem>>, vector<1x32xf32>
    %28 = vector.broadcast %27 : vector<1x32xf32> to vector<16x32xf32>
    %29 = arith.addf %26, %28 : vector<16x32xf32>
    %c0_14 = arith.constant 0 : index
    %c0_15 = arith.constant 0 : index
    %30 = vector.load %arg10[%c0_14, %c0_15] : memref<16x32xf32, #tpu.memory_space<vmem>>, vector<16x32xf32>
    tpu.vector_store %arg10[%c0_14, %c0_15], %29 {strides = array<i32>} : memref<16x32xf32, #tpu.memory_space<vmem>>, vector<16x32xf32>,
    %c0_16 = arith.constant 0 : index
    %c0_17 = arith.constant 0 : index
    %31 = vector.load %arg5[%c0_16, %c0_17] : memref<32x32xf32, #tpu.memory_space<vmem>>, vector<32x32xf32>
    %cst_18 = arith.constant dense<0.000000e+00> : vector<16x32xf32>
    %32 = tpu.matmul %24, %31, %cst_18 {dimension_numbers = #tpu.dot_dimension_numbers<[1], [0], [0], [1], [0, 0, 1, 1], [], []>} : vector<16x32xf32>, vector<32x32xf32>, vector<16x32xf32> -> vector<16x32xf32>
    %c0_19 = arith.constant 0 : index
    %c0_20 = arith.constant 0 : index
    %33 = vector.load %arg8[%c0_19, %c0_20] : memref<1x32xf32, #tpu.memory_space<vmem>>, vector<1x32xf32>
    %34 = vector.broadcast %33 : vector<1x32xf32> to vector<16x32xf32>
    %35 = arith.addf %32, %34 : vector<16x32xf32>
    %c0_21 = arith.constant 0 : index
    %c0_22 = arith.constant 0 : index
    %36 = vector.load %arg11[%c0_21, %c0_22] : memref<16x32xf32, #tpu.memory_space<vmem>>, vector<16x32xf32>
    tpu.vector_store %arg11[%c0_21, %c0_22], %35 {strides = array<i32>} : memref<16x32xf32, #tpu.memory_space<vmem>>, vector<16x32xf32>,
    %c0_23 = arith.constant 0 : index
    %c0_24 = arith.constant 0 : index
    %37 = vector.load %arg6[%c0_23, %c0_24] : memref<32x32xf32, #tpu.memory_space<vmem>>, vector<32x32xf32>
    %cst_25 = arith.constant dense<0.000000e+00> : vector<16x32xf32>
    %38 = tpu.matmul %24, %37, %cst_25 {dimension_numbers = #tpu.dot_dimension_numbers<[1], [0], [0], [1], [0, 0, 1, 1], [], []>} : vector<16x32xf32>, vector<32x32xf32>, vector<16x32xf32> -> vector<16x32xf32>
    %c0_26 = arith.constant 0 : index
    %c0_27 = arith.constant 0 : index
    %39 = vector.load %arg9[%c0_26, %c0_27] : memref<1x32xf32, #tpu.memory_space<vmem>>, vector<1x32xf32>
    %40 = vector.broadcast %39 : vector<1x32xf32> to vector<16x32xf32>
    %41 = arith.addf %38, %40 : vector<16x32xf32>
    %c0_28 = arith.constant 0 : index
    %c0_29 = arith.constant 0 : index
    %42 = vector.load %arg12[%c0_28, %c0_29] : memref<16x32xf32, #tpu.memory_space<vmem>>, vector<16x32xf32>
    tpu.vector_store %arg12[%c0_28, %c0_29], %41 {strides = array<i32>} : memref<16x32xf32, #tpu.memory_space<vmem>>, vector<16x32xf32>,
    return
  }
  func.func @transform_0(%arg0: i32) -> (i32, i32) {
    %c0_i32 = arith.constant 0 : i32
    %c0_i32_0 = arith.constant 0 : i32
    return %arg0, %c0_i32 : i32, i32
  }
  func.func @transform_1(%arg0: i32) -> (i32, i32) {
    %c0_i32 = arith.constant 0 : i32
    %c0_i32_0 = arith.constant 0 : i32
    %c0_i32_1 = arith.constant 0 : i32
    return %c0_i32, %c0_i32_0 : i32, i32
  }
  func.func @transform_2(%arg0: i32) -> (i32, i32) {
    %c0_i32 = arith.constant 0 : i32
    %c0_i32_0 = arith.constant 0 : i32
    %c0_i32_1 = arith.constant 0 : i32
    return %c0_i32, %c0_i32_0 : i32, i32
  }
  func.func @transform_3(%arg0: i32) -> (i32, i32) {
    %c0_i32 = arith.constant 0 : i32
    %c0_i32_0 = arith.constant 0 : i32
    %c0_i32_1 = arith.constant 0 : i32
    return %c0_i32, %c0_i32_0 : i32, i32
  }
  func.func @transform_4(%arg0: i32) -> (i32, i32) {
    %c0_i32 = arith.constant 0 : i32
    %c0_i32_0 = arith.constant 0 : i32
    %c0_i32_1 = arith.constant 0 : i32
    return %c0_i32, %c0_i32_0 : i32, i32
  }
  func.func @transform_5(%arg0: i32) -> (i32, i32) {
    %c0_i32 = arith.constant 0 : i32
    %c0_i32_0 = arith.constant 0 : i32
    %c0_i32_1 = arith.constant 0 : i32
    return %c0_i32, %c0_i32_0 : i32, i32
  }
  func.func @transform_6(%arg0: i32) -> (i32, i32) {
    %c0_i32 = arith.constant 0 : i32
    %c0_i32_0 = arith.constant 0 : i32
    %c0_i32_1 = arith.constant 0 : i32
    return %c0_i32, %c0_i32_0 : i32, i32
  }
  func.func @transform_7(%arg0: i32) -> (i32, i32) {
    %c0_i32 = arith.constant 0 : i32
    %c0_i32_0 = arith.constant 0 : i32
    %c0_i32_1 = arith.constant 0 : i32
    return %c0_i32, %c0_i32_0 : i32, i32
  }
  func.func @transform_8(%arg0: i32) -> (i32, i32) {
    %c0_i32 = arith.constant 0 : i32
    %c0_i32_0 = arith.constant 0 : i32
    %c0_i32_1 = arith.constant 0 : i32
    return %c0_i32, %c0_i32_0 : i32, i32
  }
  func.func @transform_9(%arg0: i32) -> (i32, i32) {
    %c0_i32 = arith.constant 0 : i32
    %c0_i32_0 = arith.constant 0 : i32
    return %arg0, %c0_i32 : i32, i32
  }
  func.func @transform_10(%arg0: i32) -> (i32, i32) {
    %c0_i32 = arith.constant 0 : i32
    %c0_i32_0 = arith.constant 0 : i32
    return %arg0, %c0_i32 : i32, i32
  }
  func.func @transform_11(%arg0: i32) -> (i32, i32) {
    %c0_i32 = arith.constant 0 : i32
    %c0_i32_0 = arith.constant 0 : i32
    return %arg0, %c0_i32 : i32, i32
  }
}

module attributes {stable_mosaic.version = 11 : i64} {
  func.func @_ln_qkv_kernel(%arg0: i32, %arg1: memref<16x32xf32, #tpu.memory_space<vmem>>, %arg2: memref<1x32xf32, #tpu.memory_space<vmem>>, %arg3: memref<1x32xf32, #tpu.memory_space<vmem>>, %arg4: memref<32x32xf32, #tpu.memory_space<vmem>>, %arg5: memref<32x32xf32, #tpu.memory_space<vmem>>, %arg6: memref<32x32xf32, #tpu.memory_space<vmem>>, %arg7: memref<1x32xf32, #tpu.memory_space<vmem>>, %arg8: memref<1x32xf32, #tpu.memory_space<vmem>>, %arg9: memref<1x32xf32, #tpu.memory_space<vmem>>, %arg10: memref<16x32xf32, #tpu.memory_space<vmem>>, %arg11: memref<16x32xf32, #tpu.memory_space<vmem>>, %arg12: memref<16x32xf32, #tpu.memory_space<vmem>>) attributes {dimension_semantics = [#tpu.dimension_semantics<parallel>], iteration_bounds = array<i64: 1>, scalar_prefetch = 0 : i64, scratch_operands = 0 : i64, tpu.core_type = #tpu.core_type<tc>, window_params = [{transform_indices = @transform_0, window_bounds = array<i64: 16, 32>}, {pipeline_mode = #tpu.pipeline_mode<synchronous>, transform_indices = @transform_1, window_bounds = array<i64: 1, 32>}, {pipeline_mode = #tpu.pipeline_mode<synchronous>, transform_indices = @transform_2, window_bounds = array<i64: 1, 32>}, {pipeline_mode = #tpu.pipeline_mode<synchronous>, transform_indices = @transform_3, window_bounds = array<i64: 32, 32>}, {pipeline_mode = #tpu.pipeline_mode<synchronous>, transform_indices = @transform_4, window_bounds = array<i64: 32, 32>}, {pipeline_mode = #tpu.pipeline_mode<synchronous>, transform_indices = @transform_5, window_bounds = array<i64: 32, 32>}, {pipeline_mode = #tpu.pipeline_mode<synchronous>, transform_indices = @transform_6, window_bounds = array<i64: 1, 32>}, {pipeline_mode = #tpu.pipeline_mode<synchronous>, transform_indices = @transform_7, window_bounds = array<i64: 1, 32>}, {pipeline_mode = #tpu.pipeline_mode<synchronous>, transform_indices = @transform_8, window_bounds = array<i64: 1, 32>}, {transform_indices = @transform_9, window_bounds = array<i64: 16, 32>}, {transform_indices = @transform_10, window_bounds = array<i64: 16, 32>}, {transform_indices = @transform_11, window_bounds = array<i64: 16, 32>}]} {
    %c0 = arith.constant 0 : index
    %c0_0 = arith.constant 0 : index
    %0 = vector.load %arg1[%c0, %c0_0] : memref<16x32xf32, #tpu.memory_space<vmem>>, vector<16x32xf32>
    %c0_1 = arith.constant 0 : index
    %c0_2 = arith.constant 0 : index
    %1 = vector.load %arg2[%c0_1, %c0_2] : memref<1x32xf32, #tpu.memory_space<vmem>>, vector<1x32xf32>
    %c0_3 = arith.constant 0 : index
    %c0_4 = arith.constant 0 : index
    %2 = vector.load %arg3[%c0_3, %c0_4] : memref<1x32xf32, #tpu.memory_space<vmem>>, vector<1x32xf32>
    %cst = arith.constant dense<0.000000e+00> : vector<16xf32>
    %3 = vector.multi_reduction <add>, %0, %cst [1] : vector<16x32xf32> to vector<16xf32>
    %4 = vector.shape_cast %3 : vector<16xf32> to vector<16x1xf32>
    %cst_5 = arith.constant 3.200000e+01 : f32
    %5 = vector.broadcast %cst_5 : f32 to vector<16x1xf32>
    %6 = arith.divf %4, %5 : vector<16x1xf32>
    %7 = vector.broadcast %6 : vector<16x1xf32> to vector<16x32xf32>
    %8 = arith.subf %0, %7 : vector<16x32xf32>
    %9 = arith.mulf %8, %8 : vector<16x32xf32>
    %cst_6 = arith.constant dense<0.000000e+00> : vector<16xf32>
    %10 = vector.multi_reduction <add>, %9, %cst_6 [1] : vector<16x32xf32> to vector<16xf32>
    %11 = vector.shape_cast %10 : vector<16xf32> to vector<16x1xf32>
    %cst_7 = arith.constant 3.200000e+01 : f32
    %12 = vector.broadcast %cst_7 : f32 to vector<16x1xf32>
    %13 = arith.divf %11, %12 : vector<16x1xf32>
    %14 = vector.broadcast %6 : vector<16x1xf32> to vector<16x32xf32>
    %15 = arith.subf %0, %14 : vector<16x32xf32>
    %cst_8 = arith.constant 9.99999997E-7 : f32
    %16 = vector.broadcast %cst_8 : f32 to vector<16x1xf32>
    %17 = arith.addf %13, %16 : vector<16x1xf32>
    %18 = math.rsqrt %17 : vector<16x1xf32>
    %19 = vector.broadcast %18 : vector<16x1xf32> to vector<16x32xf32>
    %20 = arith.mulf %15, %19 : vector<16x32xf32>
    %21 = vector.broadcast %1 : vector<1x32xf32> to vector<16x32xf32>
    %22 = arith.mulf %20, %21 : vector<16x32xf32>
    %23 = vector.broadcast %2 : vector<1x32xf32> to vector<16x32xf32>
    %24 = arith.addf %22, %23 : vector<16x32xf32>
    %c0_9 = arith.constant 0 : index
    %c0_10 = arith.constant 0 : index
    %25 = vector.load %arg4[%c0_9, %c0_10] : memref<32x32xf32, #tpu.memory_space<vmem>>, vector<32x32xf32>
    %cst_11 = arith.constant dense<0.000000e+00> : vector<16x32xf32>
    %26 = tpu.matmul %24, %25, %cst_11 {dimension_numbers = #tpu.dot_dimension_numbers<[1], [0], [0], [1], [0, 0, 1, 1], [], []>} : vector<16x32xf32>, vector<32x32xf32>, vector<16x32xf32> -> vector<16x32xf32>
    %c0_12 = arith.constant 0 : index
    %c0_13 = arith.constant 0 : index
    %27 = vector.load %arg7[%c0_12, %c0_13] : memref<1x32xf32, #tpu.memory_space<vmem>>, vector<1x32xf32>
    %28 = vector.broadcast %27 : vector<1x32xf32> to vector<16x32xf32>
    %29 = arith.addf %26, %28 : vector<16x32xf32>
    %c0_14 = arith.constant 0 : index
    %c0_15 = arith.constant 0 : index
    %30 = vector.load %arg10[%c0_14, %c0_15] : memref<16x32xf32, #tpu.memory_space<vmem>>, vector<16x32xf32>
    tpu.vector_store %arg10[%c0_14, %c0_15], %29 {strides = array<i32>} : memref<16x32xf32, #tpu.memory_space<vmem>>, vector<16x32xf32>,
    %c0_16 = arith.constant 0 : index
    %c0_17 = arith.constant 0 : index
    %31 = vector.load %arg5[%c0_16, %c0_17] : memref<32x32xf32, #tpu.memory_space<vmem>>, vector<32x32xf32>
    %cst_18 = arith.constant dense<0.000000e+00> : vector<16x32xf32>
    %32 = tpu.matmul %24, %31, %cst_18 {dimension_numbers = #tpu.dot_dimension_numbers<[1], [0], [0], [1], [0, 0, 1, 1], [], []>} : vector<16x32xf32>, vector<32x32xf32>, vector<16x32xf32> -> vector<16x32xf32>
    %c0_19 = arith.constant 0 : index
    %c0_20 = arith.constant 0 : index
    %33 = vector.load %arg8[%c0_19, %c0_20] : memref<1x32xf32, #tpu.memory_space<vmem>>, vector<1x32xf32>
    %34 = vector.broadcast %33 : vector<1x32xf32> to vector<16x32xf32>
    %35 = arith.addf %32, %34 : vector<16x32xf32>
    %c0_21 = arith.constant 0 : index
    %c0_22 = arith.constant 0 : index
    %36 = vector.load %arg11[%c0_21, %c0_22] : memref<16x32xf32, #tpu.memory_space<vmem>>, vector<16x32xf32>
    tpu.vector_store %arg11[%c0_21, %c0_22], %35 {strides = array<i32>} : memref<16x32xf32, #tpu.memory_space<vmem>>, vector<16x32xf32>,
    %c0_23 = arith.constant 0 : index
    %c0_24 = arith.constant 0 : index
    %37 = vector.load %arg6[%c0_23, %c0_24] : memref<32x32xf32, #tpu.memory_space<vmem>>, vector<32x32xf32>
    %cst_25 = arith.constant dense<0.000000e+00> : vector<16x32xf32>
    %38 = tpu.matmul %24, %37, %cst_25 {dimension_numbers = #tpu.dot_dimension_numbers<[1], [0], [0], [1], [0, 0, 1, 1], [], []>} : vector<16x32xf32>, vector<32x32xf32>, vector<16x32xf32> -> vector<16x32xf32>
    %c0_26 = arith.constant 0 : index
    %c0_27 = arith.constant 0 : index
    %39 = vector.load %arg9[%c0_26, %c0_27] : memref<1x32xf32, #tpu.memory_space<vmem>>, vector<1x32xf32>
    %40 = vector.broadcast %39 : vector<1x32xf32> to vector<16x32xf32>
    %41 = arith.addf %38, %40 : vector<16x32xf32>
    %c0_28 = arith.constant 0 : index
    %c0_29 = arith.constant 0 : index
    %42 = vector.load %arg12[%c0_28, %c0_29] : memref<16x32xf32, #tpu.memory_space<vmem>>, vector<16x32xf32>
    tpu.vector_store %arg12[%c0_28, %c0_29], %41 {strides = array<i32>} : memref<16x32xf32, #tpu.memory_space<vmem>>, vector<16x32xf32>,
    return
  }
  func.func @transform_0(%arg0: i32) -> (i32, i32) {
    %c0_i32 = arith.constant 0 : i32
    %c0_i32_0 = arith.constant 0 : i32
    return %arg0, %c0_i32 : i32, i32
  }
  func.func @transform_1(%arg0: i32) -> (i32, i32) {
    %c0_i32 = arith.constant 0 : i32
    %c0_i32_0 = arith.constant 0 : i32
    %c0_i32_1 = arith.constant 0 : i32
    return %c0_i32, %c0_i32_0 : i32, i32
  }
  func.func @transform_2(%arg0: i32) -> (i32, i32) {
    %c0_i32 = arith.constant 0 : i32
    %c0_i32_0 = arith.constant 0 : i32
    %c0_i32_1 = arith.constant 0 : i32
    return %c0_i32, %c0_i32_0 : i32, i32
  }
  func.func @transform_3(%arg0: i32) -> (i32, i32) {
    %c0_i32 = arith.constant 0 : i32
    %c0_i32_0 = arith.constant 0 : i32
    %c0_i32_1 = arith.constant 0 : i32
    return %c0_i32, %c0_i32_0 : i32, i32
  }
  func.func @transform_4(%arg0: i32) -> (i32, i32) {
    %c0_i32 = arith.constant 0 : i32
    %c0_i32_0 = arith.constant 0 : i32
    %c0_i32_1 = arith.constant 0 : i32
    return %c0_i32, %c0_i32_0 : i32, i32
  }
  func.func @transform_5(%arg0: i32) -> (i32, i32) {
    %c0_i32 = arith.constant 0 : i32
    %c0_i32_0 = arith.constant 0 : i32
    %c0_i32_1 = arith.constant 0 : i32
    return %c0_i32, %c0_i32_0 : i32, i32
  }
  func.func @transform_6(%arg0: i32) -> (i32, i32) {
    %c0_i32 = arith.constant 0 : i32
    %c0_i32_0 = arith.constant 0 : i32
    %c0_i32_1 = arith.constant 0 : i32
    return %c0_i32, %c0_i32_0 : i32, i32
  }
  func.func @transform_7(%arg0: i32) -> (i32, i32) {
    %c0_i32 = arith.constant 0 : i32
    %c0_i32_0 = arith.constant 0 : i32
    %c0_i32_1 = arith.constant 0 : i32
    return %c0_i32, %c0_i32_0 : i32, i32
  }
  func.func @transform_8(%arg0: i32) -> (i32, i32) {
    %c0_i32 = arith.constant 0 : i32
    %c0_i32_0 = arith.constant 0 : i32
    %c0_i32_1 = arith.constant 0 : i32
    return %c0_i32, %c0_i32_0 : i32, i32
  }
  func.func @transform_9(%arg0: i32) -> (i32, i32) {
    %c0_i32 = arith.constant 0 : i32
    %c0_i32_0 = arith.constant 0 : i32
    return %arg0, %c0_i32 : i32, i32
  }
  func.func @transform_10(%arg0: i32) -> (i32, i32) {
    %c0_i32 = arith.constant 0 : i32
    %c0_i32_0 = arith.constant 0 : i32
    return %arg0, %c0_i32 : i32, i32
  }
  func.func @transform_11(%arg0: i32) -> (i32, i32) {
    %c0_i32 = arith.constant 0 : i32
    %c0_i32_0 = arith.constant 0 : i32
    return %arg0, %c0_i32 : i32, i32
  }
}

</mosaic_0001>

<bundles_post_ra>
// kernel: tpu_custom_call.1
= control target key start
LH: loop header
LB: loop body
LE: loop exit
PB: predicated region body
PF: predicated region fallthrough
CT: control target
= control target key end

     0   :  { %17 = vsyncpa [#allocation3], 0  ;;  %s1163_s0 = inlined_call_operand.hbm [shape: f32[16,32], index: 0, kind: input, shape index: {}]   ;;  %s1164_s1 = inlined_call_operand.hbm [shape: f32[1,32], index: 1, kind: input, shape index: {}]   ;;  %s1165_s2 = inlined_call_operand.hbm [shape: f32[1,32], index: 2, kind: input, shape index: {}]   ;;  %s1166_s3 = inlined_call_operand.hbm [shape: f32[32,32], index: 3, kind: input, shape index: {}]   ;;  %s1167_s4 = inlined_call_operand.hbm [shape: f32[32,32], index: 4, kind: input, shape index: {}]   ;;  %s1168_s5 = inlined_call_operand.hbm [shape: f32[32,32], index: 5, kind: input, shape index: {}]   ;;  %s1169_s6 = inlined_call_operand.hbm [shape: f32[1,32], index: 6, kind: input, shape index: {}]   ;;  %s1170_s7 = inlined_call_operand.hbm [shape: f32[1,32], index: 7, kind: input, shape index: {}]   ;;  %s1171_s8 = inlined_call_operand.hbm [shape: f32[1,32], index: 8, kind: input, shape index: {}]   ;;  %s1172_s9 = inlined_call_operand.hbm [shape: f32[16,32], index: 9, kind: output, shape index: {0}]   ;;  %s1173_s10 = inlined_call_operand.hbm [shape: f32[16,32], index: 10, kind: output, shape index: {1}]   ;;  %s1174_s11 = inlined_call_operand.hbm [shape: f32[16,32], index: 11, kind: output, shape index: {2}]  }
   0x1   :  { %18 = vsyncpa [#allocation6], 0 }
   0x2   :  { %19 = vsyncpa [#allocation9], 0 }
   0x3   :  { %20 = vsyncpa [#allocation12], 0 }
   0x4   :  { %21 = vsyncpa [#allocation15], 0 }
   0x5   :  { %22 = vsyncpa [#allocation4], 0 }
   0x6   :  { %23 = vsyncpa [#allocation19], 0  ;;  %s901_s17 = smov [#allocation5]   ;;  %s623_s21 = scalar_lea.hbm %s1164_s1, 16 }
   0x7   :  { %s42_s18 = sshll.u32 %s901_s17, 4  ;;  %p624_p0 = scmp.ne.s32.totalorder %s1164_s1, %s623_s21  ;;  %s43_s18 = int_to_ptr.vmem [resolvable:$true] %s42_s18 }
   0x8   :  { %p627_p1 = scmp.lt.u32.totalorder %s623_s21, %s1164_s1 }
   0xa   :  { %p629_p2 = pnand %p627_p1, %p624_p0 }
   0xc   :  { %632 = shalt.err (!%p629_p2)
}
   0xd   :  { %s633_s26 = scalar_lea.vmem %s43_s18, 16  ;;  %s637_s27 = scalar_lea.vmem %s43_s18, 32 }
   0xe   :  { %p634_p3 = scmp.ne.s32.totalorder %s43_s18, %s633_s26  ;;  %p638_p4 = scmp.lt.s32.totalorder %s43_s18, %s43_s18 }
   0xf   :  { %p639_p5 = scmp.lt.s32.totalorder %s637_s27, %s633_s26 }
  0x11   :  { %p640_p6 = por %p639_p5, %p638_p4 }
  0x13   :  { %p641_p7 = pnand %p640_p6, %p634_p3 }
  0x15   :  { %644 = shalt.err (!%p641_p7)
}
  0x16   :  { %45 = dma.hbm_to_vmem [thread:$0]  %s1164_s1, 16, %s43_s18, [#allocation6]  }
  0x17   :  { %s902_s30 = smov [#allocation8]   ;;  %s903_s13 = smov [#allocation11]  }
  0x18   :  { %s61_s12 = sshll.u32 %s902_s30, 4  ;;  %s85_s14 = sshll.u32 %s903_s13, 4  ;;  %s62_s12 = int_to_ptr.vmem [resolvable:$true] %s61_s12  ;;  %s86_s14 = int_to_ptr.vmem [resolvable:$true] %s85_s14 }
  0x19   :  { %s645_s17 = scalar_lea.hbm %s1166_s3, 512 }
  0x1a   :  { %p646_p8 = scmp.ne.s32.totalorder %s1166_s3, %s645_s17  ;;  %p649_p9 = scmp.lt.u32.totalorder %s645_s17, %s1166_s3 }
  0x1c   :  { %p651_p10 = pnand %p649_p9, %p646_p8 }
  0x1e   :  { %654 = shalt.err (!%p651_p10)
}
  0x1f   :  { %s655_s1 = scalar_lea.vmem %s62_s12, 512  ;;  %p660_p12 = scmp.lt.s32.totalorder %s62_s12, %s62_s12 }
  0x20   :  { %p656_p11 = scmp.ne.s32.totalorder %s62_s12, %s655_s1  ;;  %p661_p13 = scmp.lt.s32.totalorder %s655_s1, %s655_s1 }
  0x22   :  { %p662_p0 = por %p661_p13, %p660_p12 }
  0x24   :  { %p663_p1 = pnand %p662_p0, %p656_p11 }
  0x26   :  { %666 = shalt.err (!%p663_p1)
}
  0x27   :  { %s904_s18 = smov 128   ;;  %s905_s23 = smov 8  }
  0x28   :  { %67 = dma.hbm_to_vmem [thread:$0]  %s1166_s3, 512, %s62_s12, [#allocation9], %s904_s18, %s904_s18, %s905_s23  }
  0x29   :  { %s667_s28 = scalar_lea.hbm %s1168_s5, 512 }
  0x2a   :  { %p668_p2 = scmp.ne.s32.totalorder %s1168_s5, %s667_s28  ;;  %p671_p3 = scmp.lt.u32.totalorder %s667_s28, %s1168_s5 }
  0x2c   :  { %p673_p4 = pnand %p671_p3, %p668_p2 }
  0x2e   :  { %676 = shalt.err (!%p673_p4)
}
  0x2f   :  { %s677_s16 = scalar_lea.vmem %s86_s14, 512  ;;  %p682_p6 = scmp.lt.s32.totalorder %s86_s14, %s86_s14 }
  0x30   :  { %p678_p5 = scmp.ne.s32.totalorder %s86_s14, %s677_s16  ;;  %p683_p7 = scmp.lt.s32.totalorder %s677_s16, %s677_s16 }
  0x32   :  { %p684_p8 = por %p683_p7, %p682_p6 }
  0x34   :  { %p685_p9 = pnand %p684_p8, %p678_p5 }
  0x36   :  { %688 = shalt.err (!%p685_p9)
}
  0x37   :  { %91 = dma.hbm_to_vmem [thread:$0]  %s1168_s5, 512, %s86_s14, [#allocation12], %s904_s18, %s904_s18, %s905_s23  }
  0x38   :  { %s906_s17 = smov [#allocation14]   ;;  %s907_s20 = smov [#allocation2]  }
  0x39   :  { %s108_s19 = sshll.u32 %s906_s17, 4  ;;  %s29_s21 = sshll.u32 %s907_s20, 4  ;;  %s109_s19 = int_to_ptr.vmem [resolvable:$true] %s108_s19  ;;  %s30_s21 = int_to_ptr.vmem [resolvable:$true] %s29_s21 }
  0x3a   :  { %s689_s24 = scalar_lea.hbm %s1170_s7, 16 }
  0x3b   :  { %p690_p10 = scmp.ne.s32.totalorder %s1170_s7, %s689_s24  ;;  %p693_p11 = scmp.lt.u32.totalorder %s689_s24, %s1170_s7 }
  0x3d   :  { %p695_p12 = pnand %p693_p11, %p690_p10 }
  0x3f   :  { %698 = shalt.err (!%p695_p12)
}
  0x40   :  { %s699_s5 = scalar_lea.vmem %s109_s19, 16  ;;  %s703_s14 = scalar_lea.vmem %s109_s19, 32 }
  0x41   :  { %p700_p13 = scmp.ne.s32.totalorder %s109_s19, %s699_s5  ;;  %p704_p0 = scmp.lt.s32.totalorder %s109_s19, %s109_s19 }
  0x42   :  { %p705_p1 = scmp.lt.s32.totalorder %s703_s14, %s699_s5 }
  0x44   :  { %p706_p2 = por %p705_p1, %p704_p0 }
  0x46   :  { %p707_p3 = pnand %p706_p2, %p700_p13 }
  0x48   :  { %710 = shalt.err (!%p707_p3)
}
  0x49   :  { %111 = dma.hbm_to_vmem [thread:$0]  %s1170_s7, 16, %s109_s19, [#allocation15]  }
  0x4a   :  { %s711_s16 = scalar_lea.hbm %s1163_s0, 256 }
  0x4b   :  { %p712_p4 = scmp.ne.s32.totalorder %s1163_s0, %s711_s16  ;;  %p715_p5 = scmp.lt.u32.totalorder %s711_s16, %s1163_s0 }
  0x4d   :  { %p717_p6 = pnand %p715_p5, %p712_p4 }
  0x4f   :  { %720 = shalt.err (!%p717_p6)
}
  0x50   :  { %s721_s22 = scalar_lea.vmem %s30_s21, 256  ;;  %p726_p8 = scmp.lt.s32.totalorder %s30_s21, %s30_s21 }
  0x51   :  { %p722_p7 = scmp.ne.s32.totalorder %s30_s21, %s721_s22  ;;  %p727_p9 = scmp.lt.s32.totalorder %s721_s22, %s721_s22 }
  0x53   :  { %p728_p10 = por %p727_p9, %p726_p8 }
  0x55   :  { %p729_p11 = pnand %p728_p10, %p722_p7 }
  0x57   :  { %732 = shalt.err (!%p729_p11)
}
  0x58   :  { %35 = dma.hbm_to_vmem [thread:$0]  %s1163_s0, 256, %s30_s21, [#allocation3], %s904_s18, %s904_s18, %s905_s23  }
  0x59   :  { %s908_s1 = smov [#allocation7]   ;;  %s909_s25 = smov [#allocation10]  }
  0x5a   :  { %s52_s24 = sshll.u32 %s908_s1, 4  ;;  %s73_s26 = sshll.u32 %s909_s25, 4  ;;  %s53_s24 = int_to_ptr.vmem [resolvable:$true] %s52_s24  ;;  %s74_s26 = int_to_ptr.vmem [resolvable:$true] %s73_s26 }
  0x5b   :  { %s733_s5 = scalar_lea.hbm %s1165_s2, 16 }
  0x5c   :  { %p734_p12 = scmp.ne.s32.totalorder %s1165_s2, %s733_s5  ;;  %p737_p13 = scmp.lt.u32.totalorder %s733_s5, %s1165_s2 }
  0x5e   :  { %p739_p0 = pnand %p737_p13, %p734_p12 }
  0x60   :  { %742 = shalt.err (!%p739_p0)
}
  0x61   :  { %s743_s0 = scalar_lea.vmem %s53_s24, 16  ;;  %s747_s21 = scalar_lea.vmem %s53_s24, 32 }
  0x62   :  { %p744_p1 = scmp.ne.s32.totalorder %s53_s24, %s743_s0  ;;  %p748_p2 = scmp.lt.s32.totalorder %s53_s24, %s53_s24 }
  0x63   :  { %p749_p3 = scmp.lt.s32.totalorder %s747_s21, %s743_s0 }
  0x65   :  { %p750_p4 = por %p749_p3, %p748_p2 }
  0x67   :  { %p751_p5 = pnand %p750_p4, %p744_p1 }
  0x69   :  { %754 = shalt.err (!%p751_p5)
}
  0x6a   :  { %55 = dma.hbm_to_vmem [thread:$0]  %s1165_s2, 16, %s53_s24, [#allocation6]  }
  0x6b   :  { %s755_s17 = scalar_lea.hbm %s1167_s4, 512 }
  0x6c   :  { %p756_p6 = scmp.ne.s32.totalorder %s1167_s4, %s755_s17  ;;  %p759_p7 = scmp.lt.u32.totalorder %s755_s17, %s1167_s4 }
  0x6e   :  { %p761_p8 = pnand %p759_p7, %p756_p6 }
  0x70   :  { %764 = shalt.err (!%p761_p8)
}
  0x71   :  { %s765_s1 = scalar_lea.vmem %s74_s26, 512  ;;  %p770_p10 = scmp.lt.s32.totalorder %s74_s26, %s74_s26 }
  0x72   :  { %p766_p9 = scmp.ne.s32.totalorder %s74_s26, %s765_s1  ;;  %p771_p11 = scmp.lt.s32.totalorder %s765_s1, %s765_s1 }
  0x74   :  { %p772_p12 = por %p771_p11, %p770_p10 }
  0x76   :  { %p773_p13 = pnand %p772_p12, %p766_p9 }
  0x78   :  { %776 = shalt.err (!%p773_p13)
}
  0x79   :  { %79 = dma.hbm_to_vmem [thread:$0]  %s1167_s4, 512, %s74_s26, [#allocation9], %s904_s18, %s904_s18, %s905_s23  }
  0x7a   :  { %s910_s25 = smov [#allocation13]   ;;  %s911_s28 = smov [#allocation16]  }
  0x7b   :  { %s98_s27 = sshll.u32 %s910_s25, 4  ;;  %s118_s5 = sshll.u32 %s911_s28, 4  ;;  %s99_s27 = int_to_ptr.vmem [resolvable:$true] %s98_s27  ;;  %s119_s5 = int_to_ptr.vmem [resolvable:$true] %s118_s5 }
  0x7c   :  { %s777_s30 = scalar_lea.hbm %s1169_s6, 16 }
  0x7d   :  { %p778_p0 = scmp.ne.s32.totalorder %s1169_s6, %s777_s30  ;;  %p781_p1 = scmp.lt.u32.totalorder %s777_s30, %s1169_s6 }
  0x7f   :  { %p783_p2 = pnand %p781_p1, %p778_p0 }
  0x81   :  { %786 = shalt.err (!%p783_p2)
}
  0x82   :  { %s787_s4 = scalar_lea.vmem %s99_s27, 16  ;;  %s791_s26 = scalar_lea.vmem %s99_s27, 32 }
  0x83   :  { %p788_p3 = scmp.ne.s32.totalorder %s99_s27, %s787_s4  ;;  %p792_p4 = scmp.lt.s32.totalorder %s99_s27, %s99_s27 }
  0x84   :  { %p793_p5 = scmp.lt.s32.totalorder %s791_s26, %s787_s4 }
  0x86   :  { %p794_p6 = por %p793_p5, %p792_p4 }
  0x88   :  { %p795_p7 = pnand %p794_p6, %p788_p3 }
  0x8a   :  { %798 = shalt.err (!%p795_p7)
}
  0x8b   :  { %101 = dma.hbm_to_vmem [thread:$0]  %s1169_s6, 16, %s99_s27, [#allocation12]  }
  0x8c   :  { %s799_s20 = scalar_lea.hbm %s1171_s8, 16 }
  0x8d   :  { %p800_p8 = scmp.ne.s32.totalorder %s1171_s8, %s799_s20  ;;  %p803_p9 = scmp.lt.u32.totalorder %s799_s20, %s1171_s8 }
  0x8f   :  { %p805_p10 = pnand %p803_p9, %p800_p8 }
  0x91   :  { %808 = shalt.err (!%p805_p10)
}
  0x92   :  { %s809_s2 = scalar_lea.vmem %s119_s5, 16  ;;  %s813_s24 = scalar_lea.vmem %s119_s5, 32 }
  0x93   :  { %p810_p11 = scmp.ne.s32.totalorder %s119_s5, %s809_s2  ;;  %p814_p12 = scmp.lt.s32.totalorder %s119_s5, %s119_s5 }
  0x94   :  { %p815_p13 = scmp.lt.s32.totalorder %s813_s24, %s809_s2 }
  0x96   :  { %p816_p0 = por %p815_p13, %p814_p12 }
  0x98   :  { %p817_p1 = pnand %p816_p0, %p810_p11 }
  0x9a   :  { %820 = shalt.err (!%p817_p1)
}
  0x9b   :  { %121 = dma.hbm_to_vmem [thread:$0]  %s1171_s8, 16, %s119_s5, [#allocation15]  }
  0x9c   :  { %887 = dma.done.wait [#allocation3], 256  }
  0x9d   :  { %888 = vsyncadd [#allocation3], 4294967040 }
  0x9e   :  { %889 = dma.done.wait [#allocation6], 32  }
  0x9f   :  { %890 = vsyncadd [#allocation6], 4294967264 }
  0xa0   :  { %891 = dma.done.wait [#allocation9], 1024  }
  0xa1   :  { %892 = vsyncadd [#allocation9], 4294966272 }
  0xa2   :  { %893 = dma.done.wait [#allocation12], 528  }
  0xa3   :  { %894 = vsyncadd [#allocation12], 4294966768 }
  0xa4   :  { %895 = dma.done.wait [#allocation15], 32  }
  0xa5   :  { %896 = vsyncadd [#allocation15], 4294967264  ;;  %vm153_vm0 = vcmask 261120   ;;  %v149_v0 = vld [vmem:[#allocation2] sm:$0xff]  ;;  %v150_v1 = vld [vmem:[#allocation2 + $0x8] sm:$0xff]  ;;  %s912_s8 = smov [#allocation18]  }
  0xa6   :  { %v154_v2 = vsel %vm153_vm0, %v149_v0, 0.0  ;;  %v157_v3 = vsel %vm153_vm0, %v150_v1, 0.0  ;;  %v197_v14 = vld [vmem:[#allocation8] sm:$0xff]  ;;  %v198_v15 = vld [vmem:[#allocation8 + $0x8] sm:$0xff]  ;;  %v199_v19 = vld [vmem:[#allocation8 + $0x10] sm:$0xff]  ;;  %s484_s27 = sshll.u32 %s912_s8, 4  ;;  %s485_s27 = int_to_ptr.vmem [resolvable:$true] %s484_s27 }
  0xa7   :  { %155 = vadd.xlane.f32.xlu0 %v154_v2  ;;  %v291_v16 = vld [vmem:[#allocation10] sm:$0xff]  ;;  %v581_v17 = vpack.c.bf16 %v198_v15, %v197_v14  ;;  %v292_v18 = vld [vmem:[#allocation10 + $0x8] sm:$0xff]  ;;  %v200_v20 = vld [vmem:[#allocation8 + $0x18] sm:$0xff]  ;;  %s913_s28 = smov [#allocation17]   ;;  %s821_s14 = scalar_lea.vmem %s485_s27, 256 }
  0xa8   :  { %v589_v21 = vpack.c.bf16 %v292_v18, %v291_v16  ;;  %v585_v22 = vpack.c.bf16 %v200_v20, %v199_v19  ;;  %v293_v23 = vld [vmem:[#allocation10 + $0x10] sm:$0xff]  ;;  %v294_v24 = vld [vmem:[#allocation10 + $0x18] sm:$0xff]  ;;  %v379_v26 = vld [vmem:[#allocation11] sm:$0xff]  ;;  %s472_s5 = sshll.u32 %s913_s28, 4  ;;  %p822_p2 = scmp.ne.s32.totalorder %s485_s27, %s821_s14  ;;  %s1107_s5 = int_to_ptr.vmem [resolvable:$true] %s472_s5 }
  0xa9   :  { %582 = vmatprep.subr.bf16.mxu0 %v581_v17  ;;  %v593_v25 = vpack.c.bf16 %v294_v24, %v293_v23  ;;  %v380_v27 = vld [vmem:[#allocation11 + $0x8] sm:$0xff]  ;;  %v519_v36 = vld [vmem:[#allocation5] ss:$0 sm:$0xff]  ;;  %v520_v38 = vld [vmem:[#allocation7] ss:$0 sm:$0xff]  ;;  %p826_p3 = scmp.lt.s32.totalorder %s485_s27, %s485_s27  ;;  %p827_p4 = scmp.lt.s32.totalorder %s821_s14, %s821_s14 }
  0xaa   :  { %584 = vmatpush3.bf16.msra.mxu0 %v581_v17  ;;  %590 = vmatprep.subr.bf16.mxu1 %v589_v21  ;;  %v597_v28 = vpack.c.bf16 %v380_v27, %v379_v26  ;;  %v381_v43 = vld [vmem:[#allocation11 + $0x10] sm:$0xff]  ;;  %v382_v44 = vld [vmem:[#allocation11 + $0x18] sm:$0xff]  ;;  %v521_v48 = vld [vmem:[#allocation13] ss:$0 sm:$0xff] }
  0xab   :  { %158 = vadd.xlane.f32.xlu0 %v157_v3  ;;  %592 = vmatpush3.bf16.msra.mxu1 %v589_v21  ;;  %v601_v47 = vpack.c.bf16 %v382_v44, %v381_v43  ;;  %v524_v49 = vld [vmem:[#allocation14] ss:$0 sm:$0xff]  ;;  %p828_p5 = por %p827_p4, %p826_p3 }
  0xac   :  { %586 = vmatprep.subr.bf16.mxu0 %v585_v22  ;;  %594 = vmatprep.subr.bf16.mxu1 %v593_v25 }
  0xad   :  { %p829_p6 = pnand %p828_p5, %p822_p2 }
  0xae   :  { %588 = vmatpush3.bf16.msra.mxu0 %v585_v22 }
  0xaf   :  { %596 = vmatpush3.bf16.msra.mxu1 %v593_v25  ;;  %598 = vmatprep.subr.bf16.mxu0 %v597_v28 }
 0x134   :  { %v156_v4 = vpop.xlane.xlu0 %155 }
 0x135   :  { %v161_v5 = vmul.f32 0.03125, %v156_v4 }
 0x137   :  { %v163_v6 = vsub.f32 %v149_v0, %v161_v5 }
 0x138   :  { %v159_v7 = vpop.xlane.xlu0 %158 }
 0x139   :  { %v162_v8 = vmul.f32 0.03125, %v159_v7  ;;  %v165_v9 = vmul.f32 %v163_v6, %v163_v6 }
 0x13b   :  { %v164_v10 = vsub.f32 %v150_v1, %v162_v8  ;;  %v167_v11 = vsel %vm153_vm0, %v165_v9, 0.0 }
 0x13c   :  { %168 = vadd.xlane.f32.xlu1 %v167_v11 }
 0x13d   :  { %v166_v12 = vmul.f32 %v164_v10, %v164_v10 }
 0x13f   :  { %v170_v13 = vsel %vm153_vm0, %v166_v12, 0.0 }
 0x140   :  { %171 = vadd.xlane.f32.xlu1 %v170_v13 }
 0x1c9   :  { %v169_v29 = vpop.xlane.xlu1 %168 }
 0x1ca   :  { %v173_v30 = vmul.f32 0.03125, %v169_v29 }
 0x1cc   :  { %v175_v31 = vadd.f32 1e-06, %v173_v30 }
 0x1cd   :  { %v172_v32 = vpop.xlane.xlu1 %171 }
 0x1ce   :  { %619 = vrsqrt.f32 %v175_v31  ;;  %v174_v33 = vmul.f32 0.03125, %v172_v32 }
 0x1d0   :  { %v176_v34 = vadd.f32 1e-06, %v174_v33 }
 0x1d2   :  { %621 = vrsqrt.f32 %v176_v34 }
 0x1d8   :  { %v620_v35 = vpop.eup %619 }
 0x1d9   :  { %v179_v37 = vmul.f32 %v620_v35, %v163_v6 }
 0x1db   :  { %v187_v39 = vmul.f32 %v519_v36, %v179_v37 }
 0x1dc   :  { %v622_v40 = vpop.eup %621 }
 0x1dd   :  { %v180_v41 = vmul.f32 %v622_v40, %v164_v10  ;;  %v195_v42 = vadd.f32 %v520_v38, %v187_v39 }
 0x1df   :  { %v188_v45 = vmul.f32 %v519_v36, %v180_v41  ;;  %556 = vmatprep.mubr.msk.f32.mxu0 %vm153_vm0, %v195_v42  ;;  %567 = vmatprep.mubr.msk.f32.mxu1 %vm153_vm0, %v195_v42 }
 0x1e1   :  { %v196_v46 = vadd.f32 %v520_v38, %v188_v45 }
 0x1e3   :  { %557 = vmatmul.mubr.msk.f32.vlgmr.msra.gmra.mrb[0].mxu0 %vm153_vm0, %v196_v46  ;;  %568 = vmatmul.mubr.msk.f32.vlgmr.msra.gmra.mrb[0].mxu1 %vm153_vm0, %v196_v46 }
 0x1e4   :  { %600 = vmatpush3.bf16.msra.mxu0 %v597_v28  ;;  %578 = vmatprep.mubr.msk.f32.mxu0 %vm153_vm0, %v195_v42 }
 0x1e5   :  { %602 = vmatprep.subr.bf16.mxu0 %v601_v47 }
 0x1e8   :  { %604 = vmatpush3.bf16.msra.mxu0 %v601_v47 }
 0x1eb   :  { %579 = vmatmul.mubr.msk.f32.vlgmr.msra.gmra.mrb[2].mxu0 %vm153_vm0, %v196_v46 }
 0x2b6   :  { %v558_v50 = vpop.f32.mrb[0].mxu0  ;;  %v569_v51 = vpop.f32.mrb[0].mxu1 }
 0x2b7   :  { %v286_v52 = vadd.f32 %v558_v50, %v521_v48  ;;  %v374_v53 = vadd.f32 %v569_v51, %v524_v49  ;;  %v280_v54 = vpop.f32.mrb[1].mxu0  ;;  %v368_v55 = vpop.f32.mrb[1].mxu1 }
 0x2b8   :  { %v281_v56 = vadd.f32 %v521_v48, %v280_v54  ;;  %v369_v57 = vadd.f32 %v524_v49, %v368_v55 }
 0x2b9   :  { %290 = vst.msk [vmem:[#allocation17 + $0x8] sm:$0xff] %vm153_vm0, %v286_v52  ;;  %378 = vst.msk [vmem:[#allocation18 + $0x8] sm:$0xff] %vm153_vm0, %v374_v53 }
 0x2ba   :  { %289 = vst.msk [vmem:[#allocation17] sm:$0xff] %vm153_vm0, %v281_v56  ;;  %377 = vst.msk [vmem:[#allocation18] sm:$0xff] %vm153_vm0, %v369_v57 }
 0x2bb   :  { %832 = shalt.err (!%p829_p6)
}
 0x2bc   :  { %s833_s13 = scalar_lea.hbm %s1173_s10, 256 }
 0x2bd   :  { %p834_p7 = scmp.ne.s32.totalorder %s1173_s10, %s833_s13  ;;  %p837_p8 = scmp.lt.u32.totalorder %s833_s13, %s1173_s10 }
 0x2bf   :  { %p839_p9 = pnand %p837_p8, %p834_p7 }
 0x2c1   :  { %842 = shalt.err (!%p839_p9)
}
 0x2c2   :  { %490 = dma.vmem_to_hbm [thread:$0]  %s485_s27, 256, %s1173_s10, [#allocation19], %s904_s18, %s904_s18, %s905_s23   ;;  %v527_v58 = vld [vmem:[#allocation16] ss:$0 sm:$0xff] }
 0x2c3   :  { %s843_s3 = scalar_lea.vmem %s1107_s5, 256  ;;  %p848_p11 = scmp.lt.s32.totalorder %s1107_s5, %s1107_s5 }
 0x2c4   :  { %p844_p10 = scmp.ne.s32.totalorder %s1107_s5, %s843_s3  ;;  %p849_p12 = scmp.lt.s32.totalorder %s843_s3, %s843_s3 }
 0x2c6   :  { %p850_p13 = por %p849_p12, %p848_p11 }
 0x2c8   :  { %p851_p0 = pnand %p850_p13, %p844_p10 }
 0x2ca   :  { %854 = shalt.err (!%p851_p0)
}
 0x2cb   :  { %s855_s20 = scalar_lea.hbm %s1172_s9, 256 }
 0x2cc   :  { %p856_p1 = scmp.ne.s32.totalorder %s1172_s9, %s855_s20  ;;  %p859_p2 = scmp.lt.u32.totalorder %s855_s20, %s1172_s9 }
 0x2ce   :  { %p861_p3 = pnand %p859_p2, %p856_p1 }
 0x2d0   :  { %864 = shalt.err (!%p861_p3)
}
 0x2d1   :  { %478 = dma.vmem_to_hbm [thread:$0]  %s1107_s5, 256, %s1172_s9, [#allocation4], %s904_s18, %s904_s18, %s905_s23   ;;  %v580_v59 = vpop.f32.mrb[2].mxu0 }
 0x2d2   :  { %s914_s24 = smov [#allocation20]   ;;  %v462_v60 = vadd.f32 %v580_v59, %v527_v58  ;;  %v456_v61 = vpop.f32.mrb[3].mxu0 }
 0x2d3   :  { %s496_s6 = sshll.u32 %s914_s24, 4  ;;  %v457_v62 = vadd.f32 %v527_v58, %v456_v61  ;;  %s497_s6 = int_to_ptr.vmem [resolvable:$true] %s496_s6 }
 0x2d4   :  { %466 = vst.msk [vmem:[#allocation20 + $0x8] sm:$0xff] %vm153_vm0, %v462_v60  ;;  %s865_s25 = scalar_lea.vmem %s497_s6, 256  ;;  %p870_p5 = scmp.lt.s32.totalorder %s497_s6, %s497_s6 }
 0x2d5   :  { %465 = vst.msk [vmem:[#allocation20] sm:$0xff] %vm153_vm0, %v457_v62  ;;  %p866_p4 = scmp.ne.s32.totalorder %s497_s6, %s865_s25  ;;  %p871_p6 = scmp.lt.s32.totalorder %s865_s25, %s865_s25 }
 0x2d7   :  { %p872_p7 = por %p871_p6, %p870_p5 }
 0x2d9   :  { %p873_p8 = pnand %p872_p7, %p866_p4 }
 0x2db   :  { %876 = shalt.err (!%p873_p8)
}
 0x2dc   :  { %s877_s27 = scalar_lea.hbm %s1174_s11, 256 }
 0x2dd   :  { %p878_p9 = scmp.ne.s32.totalorder %s1174_s11, %s877_s27  ;;  %p881_p10 = scmp.lt.u32.totalorder %s877_s27, %s1174_s11 }
 0x2df   :  { %p883_p11 = pnand %p881_p10, %p878_p9 }
 0x2e1   :  { %886 = shalt.err (!%p883_p11)
}
 0x2e2   :  { %502 = dma.vmem_to_hbm [thread:$0]  %s497_s6, 256, %s1174_s11, [#allocation19], %s904_s18, %s904_s18, %s905_s23  }
 0x2e3   :  { %897 = dma.done.wait [#allocation4], 256  }
 0x2e4   :  { %898 = vsyncadd [#allocation4], 4294967040 }
 0x2e5   :  { %899 = dma.done.wait [#allocation19], 512  }
 0x2e6   :  { %900 = vsyncadd [#allocation19], 4294966784 }
 0x2e7   :  { %512 = vsyncpa [#allocation3], 1 }
 0x2e8   :  { %513 = vsyncpa [#allocation6], 1 }
 0x2e9   :  { %514 = vsyncpa [#allocation9], 1 }
 0x2ea   :  { %515 = vsyncpa [#allocation12], 1 }
 0x2eb   :  { %516 = vsyncpa [#allocation15], 1 }
 0x2ec   :  { %517 = vsyncpa [#allocation4], 1 }
 0x2ed   :  { %518 = vsyncpa [#allocation19], 1 }

// kernel: tpu_custom_call.1
= control target key start
LH: loop header
LB: loop body
LE: loop exit
PB: predicated region body
PF: predicated region fallthrough
CT: control target
= control target key end

     0   :  { %17 = vsyncpa [#allocation3], 0  ;;  %s1163_s0 = inlined_call_operand.hbm [shape: f32[16,32], index: 0, kind: input, shape index: {}]   ;;  %s1164_s1 = inlined_call_operand.hbm [shape: f32[1,32], index: 1, kind: input, shape index: {}]   ;;  %s1165_s2 = inlined_call_operand.hbm [shape: f32[1,32], index: 2, kind: input, shape index: {}]   ;;  %s1166_s3 = inlined_call_operand.hbm [shape: f32[32,32], index: 3, kind: input, shape index: {}]   ;;  %s1167_s4 = inlined_call_operand.hbm [shape: f32[32,32], index: 4, kind: input, shape index: {}]   ;;  %s1168_s5 = inlined_call_operand.hbm [shape: f32[32,32], index: 5, kind: input, shape index: {}]   ;;  %s1169_s6 = inlined_call_operand.hbm [shape: f32[1,32], index: 6, kind: input, shape index: {}]   ;;  %s1170_s7 = inlined_call_operand.hbm [shape: f32[1,32], index: 7, kind: input, shape index: {}]   ;;  %s1171_s8 = inlined_call_operand.hbm [shape: f32[1,32], index: 8, kind: input, shape index: {}]   ;;  %s1172_s9 = inlined_call_operand.hbm [shape: f32[16,32], index: 9, kind: output, shape index: {0}]   ;;  %s1173_s10 = inlined_call_operand.hbm [shape: f32[16,32], index: 10, kind: output, shape index: {1}]   ;;  %s1174_s11 = inlined_call_operand.hbm [shape: f32[16,32], index: 11, kind: output, shape index: {2}]  }
   0x1   :  { %18 = vsyncpa [#allocation6], 0 }
   0x2   :  { %19 = vsyncpa [#allocation9], 0 }
   0x3   :  { %20 = vsyncpa [#allocation12], 0 }
   0x4   :  { %21 = vsyncpa [#allocation15], 0 }
   0x5   :  { %22 = vsyncpa [#allocation4], 0 }
   0x6   :  { %23 = vsyncpa [#allocation19], 0  ;;  %s901_s17 = smov [#allocation5]   ;;  %s623_s21 = scalar_lea.hbm %s1164_s1, 16 }
   0x7   :  { %s42_s18 = sshll.u32 %s901_s17, 4  ;;  %p624_p0 = scmp.ne.s32.totalorder %s1164_s1, %s623_s21  ;;  %s43_s18 = int_to_ptr.vmem [resolvable:$true] %s42_s18 }
   0x8   :  { %p627_p1 = scmp.lt.u32.totalorder %s623_s21, %s1164_s1 }
   0xa   :  { %p629_p2 = pnand %p627_p1, %p624_p0 }
   0xc   :  { %632 = shalt.err (!%p629_p2)
}
   0xd   :  { %s633_s26 = scalar_lea.vmem %s43_s18, 16  ;;  %s637_s27 = scalar_lea.vmem %s43_s18, 32 }
   0xe   :  { %p634_p3 = scmp.ne.s32.totalorder %s43_s18, %s633_s26  ;;  %p638_p4 = scmp.lt.s32.totalorder %s43_s18, %s43_s18 }
   0xf   :  { %p639_p5 = scmp.lt.s32.totalorder %s637_s27, %s633_s26 }
  0x11   :  { %p640_p6 = por %p639_p5, %p638_p4 }
  0x13   :  { %p641_p7 = pnand %p640_p6, %p634_p3 }
  0x15   :  { %644 = shalt.err (!%p641_p7)
}
  0x16   :  { %45 = dma.hbm_to_vmem [thread:$0]  %s1164_s1, 16, %s43_s18, [#allocation6]  }
  0x17   :  { %s902_s30 = smov [#allocation8]   ;;  %s903_s13 = smov [#allocation11]  }
  0x18   :  { %s61_s12 = sshll.u32 %s902_s30, 4  ;;  %s85_s14 = sshll.u32 %s903_s13, 4  ;;  %s62_s12 = int_to_ptr.vmem [resolvable:$true] %s61_s12  ;;  %s86_s14 = int_to_ptr.vmem [resolvable:$true] %s85_s14 }
  0x19   :  { %s645_s17 = scalar_lea.hbm %s1166_s3, 512 }
  0x1a   :  { %p646_p8 = scmp.ne.s32.totalorder %s1166_s3, %s645_s17  ;;  %p649_p9 = scmp.lt.u32.totalorder %s645_s17, %s1166_s3 }
  0x1c   :  { %p651_p10 = pnand %p649_p9, %p646_p8 }
  0x1e   :  { %654 = shalt.err (!%p651_p10)
}
  0x1f   :  { %s655_s1 = scalar_lea.vmem %s62_s12, 512  ;;  %p660_p12 = scmp.lt.s32.totalorder %s62_s12, %s62_s12 }
  0x20   :  { %p656_p11 = scmp.ne.s32.totalorder %s62_s12, %s655_s1  ;;  %p661_p13 = scmp.lt.s32.totalorder %s655_s1, %s655_s1 }
  0x22   :  { %p662_p0 = por %p661_p13, %p660_p12 }
  0x24   :  { %p663_p1 = pnand %p662_p0, %p656_p11 }
  0x26   :  { %666 = shalt.err (!%p663_p1)
}
  0x27   :  { %s904_s18 = smov 128   ;;  %s905_s23 = smov 8  }
  0x28   :  { %67 = dma.hbm_to_vmem [thread:$0]  %s1166_s3, 512, %s62_s12, [#allocation9], %s904_s18, %s904_s18, %s905_s23  }
  0x29   :  { %s667_s28 = scalar_lea.hbm %s1168_s5, 512 }
  0x2a   :  { %p668_p2 = scmp.ne.s32.totalorder %s1168_s5, %s667_s28  ;;  %p671_p3 = scmp.lt.u32.totalorder %s667_s28, %s1168_s5 }
  0x2c   :  { %p673_p4 = pnand %p671_p3, %p668_p2 }
  0x2e   :  { %676 = shalt.err (!%p673_p4)
}
  0x2f   :  { %s677_s16 = scalar_lea.vmem %s86_s14, 512  ;;  %p682_p6 = scmp.lt.s32.totalorder %s86_s14, %s86_s14 }
  0x30   :  { %p678_p5 = scmp.ne.s32.totalorder %s86_s14, %s677_s16  ;;  %p683_p7 = scmp.lt.s32.totalorder %s677_s16, %s677_s16 }
  0x32   :  { %p684_p8 = por %p683_p7, %p682_p6 }
  0x34   :  { %p685_p9 = pnand %p684_p8, %p678_p5 }
  0x36   :  { %688 = shalt.err (!%p685_p9)
}
  0x37   :  { %91 = dma.hbm_to_vmem [thread:$0]  %s1168_s5, 512, %s86_s14, [#allocation12], %s904_s18, %s904_s18, %s905_s23  }
  0x38   :  { %s906_s17 = smov [#allocation14]   ;;  %s907_s20 = smov [#allocation2]  }
  0x39   :  { %s108_s19 = sshll.u32 %s906_s17, 4  ;;  %s29_s21 = sshll.u32 %s907_s20, 4  ;;  %s109_s19 = int_to_ptr.vmem [resolvable:$true] %s108_s19  ;;  %s30_s21 = int_to_ptr.vmem [resolvable:$true] %s29_s21 }
  0x3a   :  { %s689_s24 = scalar_lea.hbm %s1170_s7, 16 }
  0x3b   :  { %p690_p10 = scmp.ne.s32.totalorder %s1170_s7, %s689_s24  ;;  %p693_p11 = scmp.lt.u32.totalorder %s689_s24, %s1170_s7 }
  0x3d   :  { %p695_p12 = pnand %p693_p11, %p690_p10 }
  0x3f   :  { %698 = shalt.err (!%p695_p12)
}
  0x40   :  { %s699_s5 = scalar_lea.vmem %s109_s19, 16  ;;  %s703_s14 = scalar_lea.vmem %s109_s19, 32 }
  0x41   :  { %p700_p13 = scmp.ne.s32.totalorder %s109_s19, %s699_s5  ;;  %p704_p0 = scmp.lt.s32.totalorder %s109_s19, %s109_s19 }
  0x42   :  { %p705_p1 = scmp.lt.s32.totalorder %s703_s14, %s699_s5 }
  0x44   :  { %p706_p2 = por %p705_p1, %p704_p0 }
  0x46   :  { %p707_p3 = pnand %p706_p2, %p700_p13 }
  0x48   :  { %710 = shalt.err (!%p707_p3)
}
  0x49   :  { %111 = dma.hbm_to_vmem [thread:$0]  %s1170_s7, 16, %s109_s19, [#allocation15]  }
  0x4a   :  { %s711_s16 = scalar_lea.hbm %s1163_s0, 256 }
  0x4b   :  { %p712_p4 = scmp.ne.s32.totalorder %s1163_s0, %s711_s16  ;;  %p715_p5 = scmp.lt.u32.totalorder %s711_s16, %s1163_s0 }
  0x4d   :  { %p717_p6 = pnand %p715_p5, %p712_p4 }
  0x4f   :  { %720 = shalt.err (!%p717_p6)
}
  0x50   :  { %s721_s22 = scalar_lea.vmem %s30_s21, 256  ;;  %p726_p8 = scmp.lt.s32.totalorder %s30_s21, %s30_s21 }
  0x51   :  { %p722_p7 = scmp.ne.s32.totalorder %s30_s21, %s721_s22  ;;  %p727_p9 = scmp.lt.s32.totalorder %s721_s22, %s721_s22 }
  0x53   :  { %p728_p10 = por %p727_p9, %p726_p8 }
  0x55   :  { %p729_p11 = pnand %p728_p10, %p722_p7 }
  0x57   :  { %732 = shalt.err (!%p729_p11)
}
  0x58   :  { %35 = dma.hbm_to_vmem [thread:$0]  %s1163_s0, 256, %s30_s21, [#allocation3], %s904_s18, %s904_s18, %s905_s23  }
  0x59   :  { %s908_s1 = smov [#allocation7]   ;;  %s909_s25 = smov [#allocation10]  }
  0x5a   :  { %s52_s24 = sshll.u32 %s908_s1, 4  ;;  %s73_s26 = sshll.u32 %s909_s25, 4  ;;  %s53_s24 = int_to_ptr.vmem [resolvable:$true] %s52_s24  ;;  %s74_s26 = int_to_ptr.vmem [resolvable:$true] %s73_s26 }
  0x5b   :  { %s733_s5 = scalar_lea.hbm %s1165_s2, 16 }
  0x5c   :  { %p734_p12 = scmp.ne.s32.totalorder %s1165_s2, %s733_s5  ;;  %p737_p13 = scmp.lt.u32.totalorder %s733_s5, %s1165_s2 }
  0x5e   :  { %p739_p0 = pnand %p737_p13, %p734_p12 }
  0x60   :  { %742 = shalt.err (!%p739_p0)
}
  0x61   :  { %s743_s0 = scalar_lea.vmem %s53_s24, 16  ;;  %s747_s21 = scalar_lea.vmem %s53_s24, 32 }
  0x62   :  { %p744_p1 = scmp.ne.s32.totalorder %s53_s24, %s743_s0  ;;  %p748_p2 = scmp.lt.s32.totalorder %s53_s24, %s53_s24 }
  0x63   :  { %p749_p3 = scmp.lt.s32.totalorder %s747_s21, %s743_s0 }
  0x65   :  { %p750_p4 = por %p749_p3, %p748_p2 }
  0x67   :  { %p751_p5 = pnand %p750_p4, %p744_p1 }
  0x69   :  { %754 = shalt.err (!%p751_p5)
}
  0x6a   :  { %55 = dma.hbm_to_vmem [thread:$0]  %s1165_s2, 16, %s53_s24, [#allocation6]  }
  0x6b   :  { %s755_s17 = scalar_lea.hbm %s1167_s4, 512 }
  0x6c   :  { %p756_p6 = scmp.ne.s32.totalorder %s1167_s4, %s755_s17  ;;  %p759_p7 = scmp.lt.u32.totalorder %s755_s17, %s1167_s4 }
  0x6e   :  { %p761_p8 = pnand %p759_p7, %p756_p6 }
  0x70   :  { %764 = shalt.err (!%p761_p8)
}
  0x71   :  { %s765_s1 = scalar_lea.vmem %s74_s26, 512  ;;  %p770_p10 = scmp.lt.s32.totalorder %s74_s26, %s74_s26 }
  0x72   :  { %p766_p9 = scmp.ne.s32.totalorder %s74_s26, %s765_s1  ;;  %p771_p11 = scmp.lt.s32.totalorder %s765_s1, %s765_s1 }
  0x74   :  { %p772_p12 = por %p771_p11, %p770_p10 }
  0x76   :  { %p773_p13 = pnand %p772_p12, %p766_p9 }
  0x78   :  { %776 = shalt.err (!%p773_p13)
}
  0x79   :  { %79 = dma.hbm_to_vmem [thread:$0]  %s1167_s4, 512, %s74_s26, [#allocation9], %s904_s18, %s904_s18, %s905_s23  }
  0x7a   :  { %s910_s25 = smov [#allocation13]   ;;  %s911_s28 = smov [#allocation16]  }
  0x7b   :  { %s98_s27 = sshll.u32 %s910_s25, 4  ;;  %s118_s5 = sshll.u32 %s911_s28, 4  ;;  %s99_s27 = int_to_ptr.vmem [resolvable:$true] %s98_s27  ;;  %s119_s5 = int_to_ptr.vmem [resolvable:$true] %s118_s5 }
  0x7c   :  { %s777_s30 = scalar_lea.hbm %s1169_s6, 16 }
  0x7d   :  { %p778_p0 = scmp.ne.s32.totalorder %s1169_s6, %s777_s30  ;;  %p781_p1 = scmp.lt.u32.totalorder %s777_s30, %s1169_s6 }
  0x7f   :  { %p783_p2 = pnand %p781_p1, %p778_p0 }
  0x81   :  { %786 = shalt.err (!%p783_p2)
}
  0x82   :  { %s787_s4 = scalar_lea.vmem %s99_s27, 16  ;;  %s791_s26 = scalar_lea.vmem %s99_s27, 32 }
  0x83   :  { %p788_p3 = scmp.ne.s32.totalorder %s99_s27, %s787_s4  ;;  %p792_p4 = scmp.lt.s32.totalorder %s99_s27, %s99_s27 }
  0x84   :  { %p793_p5 = scmp.lt.s32.totalorder %s791_s26, %s787_s4 }
  0x86   :  { %p794_p6 = por %p793_p5, %p792_p4 }
  0x88   :  { %p795_p7 = pnand %p794_p6, %p788_p3 }
  0x8a   :  { %798 = shalt.err (!%p795_p7)
}
  0x8b   :  { %101 = dma.hbm_to_vmem [thread:$0]  %s1169_s6, 16, %s99_s27, [#allocation12]  }
  0x8c   :  { %s799_s20 = scalar_lea.hbm %s1171_s8, 16 }
  0x8d   :  { %p800_p8 = scmp.ne.s32.totalorder %s1171_s8, %s799_s20  ;;  %p803_p9 = scmp.lt.u32.totalorder %s799_s20, %s1171_s8 }
  0x8f   :  { %p805_p10 = pnand %p803_p9, %p800_p8 }
  0x91   :  { %808 = shalt.err (!%p805_p10)
}
  0x92   :  { %s809_s2 = scalar_lea.vmem %s119_s5, 16  ;;  %s813_s24 = scalar_lea.vmem %s119_s5, 32 }
  0x93   :  { %p810_p11 = scmp.ne.s32.totalorder %s119_s5, %s809_s2  ;;  %p814_p12 = scmp.lt.s32.totalorder %s119_s5, %s119_s5 }
  0x94   :  { %p815_p13 = scmp.lt.s32.totalorder %s813_s24, %s809_s2 }
  0x96   :  { %p816_p0 = por %p815_p13, %p814_p12 }
  0x98   :  { %p817_p1 = pnand %p816_p0, %p810_p11 }
  0x9a   :  { %820 = shalt.err (!%p817_p1)
}
  0x9b   :  { %121 = dma.hbm_to_vmem [thread:$0]  %s1171_s8, 16, %s119_s5, [#allocation15]  }
  0x9c   :  { %887 = dma.done.wait [#allocation3], 256  }
  0x9d   :  { %888 = vsyncadd [#allocation3], 4294967040 }
  0x9e   :  { %889 = dma.done.wait [#allocation6], 32  }
  0x9f   :  { %890 = vsyncadd [#allocation6], 4294967264 }
  0xa0   :  { %891 = dma.done.wait [#allocation9], 1024  }
  0xa1   :  { %892 = vsyncadd [#allocation9], 4294966272 }
  0xa2   :  { %893 = dma.done.wait [#allocation12], 528  }
  0xa3   :  { %894 = vsyncadd [#allocation12], 4294966768 }
  0xa4   :  { %895 = dma.done.wait [#allocation15], 32  }
  0xa5   :  { %896 = vsyncadd [#allocation15], 4294967264  ;;  %vm153_vm0 = vcmask 261120   ;;  %v149_v0 = vld [vmem:[#allocation2] sm:$0xff]  ;;  %v150_v1 = vld [vmem:[#allocation2 + $0x8] sm:$0xff]  ;;  %s912_s8 = smov [#allocation18]  }
  0xa6   :  { %v154_v2 = vsel %vm153_vm0, %v149_v0, 0.0  ;;  %v157_v3 = vsel %vm153_vm0, %v150_v1, 0.0  ;;  %v197_v14 = vld [vmem:[#allocation8] sm:$0xff]  ;;  %v198_v15 = vld [vmem:[#allocation8 + $0x8] sm:$0xff]  ;;  %v199_v19 = vld [vmem:[#allocation8 + $0x10] sm:$0xff]  ;;  %s484_s27 = sshll.u32 %s912_s8, 4  ;;  %s485_s27 = int_to_ptr.vmem [resolvable:$true] %s484_s27 }
  0xa7   :  { %155 = vadd.xlane.f32.xlu0 %v154_v2  ;;  %v291_v16 = vld [vmem:[#allocation10] sm:$0xff]  ;;  %v581_v17 = vpack.c.bf16 %v198_v15, %v197_v14  ;;  %v292_v18 = vld [vmem:[#allocation10 + $0x8] sm:$0xff]  ;;  %v200_v20 = vld [vmem:[#allocation8 + $0x18] sm:$0xff]  ;;  %s913_s28 = smov [#allocation17]   ;;  %s821_s14 = scalar_lea.vmem %s485_s27, 256 }
  0xa8   :  { %v589_v21 = vpack.c.bf16 %v292_v18, %v291_v16  ;;  %v585_v22 = vpack.c.bf16 %v200_v20, %v199_v19  ;;  %v293_v23 = vld [vmem:[#allocation10 + $0x10] sm:$0xff]  ;;  %v294_v24 = vld [vmem:[#allocation10 + $0x18] sm:$0xff]  ;;  %v379_v26 = vld [vmem:[#allocation11] sm:$0xff]  ;;  %s472_s5 = sshll.u32 %s913_s28, 4  ;;  %p822_p2 = scmp.ne.s32.totalorder %s485_s27, %s821_s14  ;;  %s1107_s5 = int_to_ptr.vmem [resolvable:$true] %s472_s5 }
  0xa9   :  { %582 = vmatprep.subr.bf16.mxu0 %v581_v17  ;;  %v593_v25 = vpack.c.bf16 %v294_v24, %v293_v23  ;;  %v380_v27 = vld [vmem:[#allocation11 + $0x8] sm:$0xff]  ;;  %v519_v36 = vld [vmem:[#allocation5] ss:$0 sm:$0xff]  ;;  %v520_v38 = vld [vmem:[#allocation7] ss:$0 sm:$0xff]  ;;  %p826_p3 = scmp.lt.s32.totalorder %s485_s27, %s485_s27  ;;  %p827_p4 = scmp.lt.s32.totalorder %s821_s14, %s821_s14 }
  0xaa   :  { %584 = vmatpush3.bf16.msra.mxu0 %v581_v17  ;;  %590 = vmatprep.subr.bf16.mxu1 %v589_v21  ;;  %v597_v28 = vpack.c.bf16 %v380_v27, %v379_v26  ;;  %v381_v43 = vld [vmem:[#allocation11 + $0x10] sm:$0xff]  ;;  %v382_v44 = vld [vmem:[#allocation11 + $0x18] sm:$0xff]  ;;  %v521_v48 = vld [vmem:[#allocation13] ss:$0 sm:$0xff] }
  0xab   :  { %158 = vadd.xlane.f32.xlu0 %v157_v3  ;;  %592 = vmatpush3.bf16.msra.mxu1 %v589_v21  ;;  %v601_v47 = vpack.c.bf16 %v382_v44, %v381_v43  ;;  %v524_v49 = vld [vmem:[#allocation14] ss:$0 sm:$0xff]  ;;  %p828_p5 = por %p827_p4, %p826_p3 }
  0xac   :  { %586 = vmatprep.subr.bf16.mxu0 %v585_v22  ;;  %594 = vmatprep.subr.bf16.mxu1 %v593_v25 }
  0xad   :  { %p829_p6 = pnand %p828_p5, %p822_p2 }
  0xae   :  { %588 = vmatpush3.bf16.msra.mxu0 %v585_v22 }
  0xaf   :  { %596 = vmatpush3.bf16.msra.mxu1 %v593_v25  ;;  %598 = vmatprep.subr.bf16.mxu0 %v597_v28 }
 0x134   :  { %v156_v4 = vpop.xlane.xlu0 %155 }
 0x135   :  { %v161_v5 = vmul.f32 0.03125, %v156_v4 }
 0x137   :  { %v163_v6 = vsub.f32 %v149_v0, %v161_v5 }
 0x138   :  { %v159_v7 = vpop.xlane.xlu0 %158 }
 0x139   :  { %v162_v8 = vmul.f32 0.03125, %v159_v7  ;;  %v165_v9 = vmul.f32 %v163_v6, %v163_v6 }
 0x13b   :  { %v164_v10 = vsub.f32 %v150_v1, %v162_v8  ;;  %v167_v11 = vsel %vm153_vm0, %v165_v9, 0.0 }
 0x13c   :  { %168 = vadd.xlane.f32.xlu1 %v167_v11 }
 0x13d   :  { %v166_v12 = vmul.f32 %v164_v10, %v164_v10 }
 0x13f   :  { %v170_v13 = vsel %vm153_vm0, %v166_v12, 0.0 }
 0x140   :  { %171 = vadd.xlane.f32.xlu1 %v170_v13 }
 0x1c9   :  { %v169_v29 = vpop.xlane.xlu1 %168 }
 0x1ca   :  { %v173_v30 = vmul.f32 0.03125, %v169_v29 }
 0x1cc   :  { %v175_v31 = vadd.f32 1e-06, %v173_v30 }
 0x1cd   :  { %v172_v32 = vpop.xlane.xlu1 %171 }
 0x1ce   :  { %619 = vrsqrt.f32 %v175_v31  ;;  %v174_v33 = vmul.f32 0.03125, %v172_v32 }
 0x1d0   :  { %v176_v34 = vadd.f32 1e-06, %v174_v33 }
 0x1d2   :  { %621 = vrsqrt.f32 %v176_v34 }
 0x1d8   :  { %v620_v35 = vpop.eup %619 }
 0x1d9   :  { %v179_v37 = vmul.f32 %v620_v35, %v163_v6 }
 0x1db   :  { %v187_v39 = vmul.f32 %v519_v36, %v179_v37 }
 0x1dc   :  { %v622_v40 = vpop.eup %621 }
 0x1dd   :  { %v180_v41 = vmul.f32 %v622_v40, %v164_v10  ;;  %v195_v42 = vadd.f32 %v520_v38, %v187_v39 }
 0x1df   :  { %v188_v45 = vmul.f32 %v519_v36, %v180_v41  ;;  %556 = vmatprep.mubr.msk.f32.mxu0 %vm153_vm0, %v195_v42  ;;  %567 = vmatprep.mubr.msk.f32.mxu1 %vm153_vm0, %v195_v42 }
 0x1e1   :  { %v196_v46 = vadd.f32 %v520_v38, %v188_v45 }
 0x1e3   :  { %557 = vmatmul.mubr.msk.f32.vlgmr.msra.gmra.mrb[0].mxu0 %vm153_vm0, %v196_v46  ;;  %568 = vmatmul.mubr.msk.f32.vlgmr.msra.gmra.mrb[0].mxu1 %vm153_vm0, %v196_v46 }
 0x1e4   :  { %600 = vmatpush3.bf16.msra.mxu0 %v597_v28  ;;  %578 = vmatprep.mubr.msk.f32.mxu0 %vm153_vm0, %v195_v42 }
 0x1e5   :  { %602 = vmatprep.subr.bf16.mxu0 %v601_v47 }
 0x1e8   :  { %604 = vmatpush3.bf16.msra.mxu0 %v601_v47 }
 0x1eb   :  { %579 = vmatmul.mubr.msk.f32.vlgmr.msra.gmra.mrb[2].mxu0 %vm153_vm0, %v196_v46 }
 0x2b6   :  { %v558_v50 = vpop.f32.mrb[0].mxu0  ;;  %v569_v51 = vpop.f32.mrb[0].mxu1 }
 0x2b7   :  { %v286_v52 = vadd.f32 %v558_v50, %v521_v48  ;;  %v374_v53 = vadd.f32 %v569_v51, %v524_v49  ;;  %v280_v54 = vpop.f32.mrb[1].mxu0  ;;  %v368_v55 = vpop.f32.mrb[1].mxu1 }
 0x2b8   :  { %v281_v56 = vadd.f32 %v521_v48, %v280_v54  ;;  %v369_v57 = vadd.f32 %v524_v49, %v368_v55 }
 0x2b9   :  { %290 = vst.msk [vmem:[#allocation17 + $0x8] sm:$0xff] %vm153_vm0, %v286_v52  ;;  %378 = vst.msk [vmem:[#allocation18 + $0x8] sm:$0xff] %vm153_vm0, %v374_v53 }
 0x2ba   :  { %289 = vst.msk [vmem:[#allocation17] sm:$0xff] %vm153_vm0, %v281_v56  ;;  %377 = vst.msk [vmem:[#allocation18] sm:$0xff] %vm153_vm0, %v369_v57 }
 0x2bb   :  { %832 = shalt.err (!%p829_p6)
}
 0x2bc   :  { %s833_s13 = scalar_lea.hbm %s1173_s10, 256 }
 0x2bd   :  { %p834_p7 = scmp.ne.s32.totalorder %s1173_s10, %s833_s13  ;;  %p837_p8 = scmp.lt.u32.totalorder %s833_s13, %s1173_s10 }
 0x2bf   :  { %p839_p9 = pnand %p837_p8, %p834_p7 }
 0x2c1   :  { %842 = shalt.err (!%p839_p9)
}
 0x2c2   :  { %490 = dma.vmem_to_hbm [thread:$0]  %s485_s27, 256, %s1173_s10, [#allocation19], %s904_s18, %s904_s18, %s905_s23   ;;  %v527_v58 = vld [vmem:[#allocation16] ss:$0 sm:$0xff] }
 0x2c3   :  { %s843_s3 = scalar_lea.vmem %s1107_s5, 256  ;;  %p848_p11 = scmp.lt.s32.totalorder %s1107_s5, %s1107_s5 }
 0x2c4   :  { %p844_p10 = scmp.ne.s32.totalorder %s1107_s5, %s843_s3  ;;  %p849_p12 = scmp.lt.s32.totalorder %s843_s3, %s843_s3 }
 0x2c6   :  { %p850_p13 = por %p849_p12, %p848_p11 }
 0x2c8   :  { %p851_p0 = pnand %p850_p13, %p844_p10 }
 0x2ca   :  { %854 = shalt.err (!%p851_p0)
}
 0x2cb   :  { %s855_s20 = scalar_lea.hbm %s1172_s9, 256 }
 0x2cc   :  { %p856_p1 = scmp.ne.s32.totalorder %s1172_s9, %s855_s20  ;;  %p859_p2 = scmp.lt.u32.totalorder %s855_s20, %s1172_s9 }
 0x2ce   :  { %p861_p3 = pnand %p859_p2, %p856_p1 }
 0x2d0   :  { %864 = shalt.err (!%p861_p3)
}
 0x2d1   :  { %478 = dma.vmem_to_hbm [thread:$0]  %s1107_s5, 256, %s1172_s9, [#allocation4], %s904_s18, %s904_s18, %s905_s23   ;;  %v580_v59 = vpop.f32.mrb[2].mxu0 }
 0x2d2   :  { %s914_s24 = smov [#allocation20]   ;;  %v462_v60 = vadd.f32 %v580_v59, %v527_v58  ;;  %v456_v61 = vpop.f32.mrb[3].mxu0 }
 0x2d3   :  { %s496_s6 = sshll.u32 %s914_s24, 4  ;;  %v457_v62 = vadd.f32 %v527_v58, %v456_v61  ;;  %s497_s6 = int_to_ptr.vmem [resolvable:$true] %s496_s6 }
 0x2d4   :  { %466 = vst.msk [vmem:[#allocation20 + $0x8] sm:$0xff] %vm153_vm0, %v462_v60  ;;  %s865_s25 = scalar_lea.vmem %s497_s6, 256  ;;  %p870_p5 = scmp.lt.s32.totalorder %s497_s6, %s497_s6 }
 0x2d5   :  { %465 = vst.msk [vmem:[#allocation20] sm:$0xff] %vm153_vm0, %v457_v62  ;;  %p866_p4 = scmp.ne.s32.totalorder %s497_s6, %s865_s25  ;;  %p871_p6 = scmp.lt.s32.totalorder %s865_s25, %s865_s25 }
 0x2d7   :  { %p872_p7 = por %p871_p6, %p870_p5 }
 0x2d9   :  { %p873_p8 = pnand %p872_p7, %p866_p4 }
 0x2db   :  { %876 = shalt.err (!%p873_p8)
}
 0x2dc   :  { %s877_s27 = scalar_lea.hbm %s1174_s11, 256 }
 0x2dd   :  { %p878_p9 = scmp.ne.s32.totalorder %s1174_s11, %s877_s27  ;;  %p881_p10 = scmp.lt.u32.totalorder %s877_s27, %s1174_s11 }
 0x2df   :  { %p883_p11 = pnand %p881_p10, %p878_p9 }
 0x2e1   :  { %886 = shalt.err (!%p883_p11)
}
 0x2e2   :  { %502 = dma.vmem_to_hbm [thread:$0]  %s497_s6, 256, %s1174_s11, [#allocation19], %s904_s18, %s904_s18, %s905_s23  }
 0x2e3   :  { %897 = dma.done.wait [#allocation4], 256  }
 0x2e4   :  { %898 = vsyncadd [#allocation4], 4294967040 }
 0x2e5   :  { %899 = dma.done.wait [#allocation19], 512  }
 0x2e6   :  { %900 = vsyncadd [#allocation19], 4294966784 }
 0x2e7   :  { %512 = vsyncpa [#allocation3], 1 }
 0x2e8   :  { %513 = vsyncpa [#allocation6], 1 }
 0x2e9   :  { %514 = vsyncpa [#allocation9], 1 }
 0x2ea   :  { %515 = vsyncpa [#allocation12], 1 }
 0x2eb   :  { %516 = vsyncpa [#allocation15], 1 }
 0x2ec   :  { %517 = vsyncpa [#allocation4], 1 }
 0x2ed   :  { %518 = vsyncpa [#allocation19], 1 }

</bundles_post_ra>
